<compile_context>
chip_gen: v5e
topology: v5e:2x2
jax: 0.10.0
libtpu: 0.0.40
codegen_flags: <defaults>
</compile_context>

<pallas_src>
import functools

import jax
import jax.numpy as jnp
from jax import lax
from jax.experimental import pallas as pl
from jax.experimental.pallas import tpu as pltpu

EPS = 1e-5                 # nn.BatchNorm2d default
LANE = 128                 # TPU lane width
MXU_DTYPE = jnp.bfloat16   # MXU input dtype (accumulation stays f32)


def _round_up(x, m):
    return (x + m - 1) // m * m


def _pad_lanes(a, target):
    pad = target - a.shape[-1]
    if pad == 0:
        return a
    return jnp.pad(a, [(0, 0)] * (a.ndim - 1) + [(0, pad)])


# ------------------------------ Pallas kernels -------------------------------

def _pool_conv_stats_kernel(x_ref, w_ref, m_ref, y_ref, sum_ref, ssq_ref,
                            z_scr, *, Hh, Wh, Wp, T):
    """Fused MaxPool2d(2) + Conv3x3(pad=1, no bias) + BN partial statistics.

    x_ref : (H, W, Cin)   raw NHWC block for one batch element
    w_ref : (9, Cin, Cp)  bf16 conv taps (kh*3+kw, in, out-padded-to-128)
    m_ref : (T, 1)        1.0 on valid output rows, 0.0 on wrap-around rows
    y_ref : (T, Cp)       bf16 pre-BN conv output (flat rows y*Wp + x)
    z_scr : (S, Cin)      f32 zero-padded flat input scratch
    """
    cin = x_ref.shape[-1]

    # ---- 2x2 max-pool.  W (sublane) direction via strided ref loads,
    #      H (leading) direction via a leading-dim-only reshape. ----
    c0 = x_ref[:, pl.ds(0, Wh, stride=2), :]          # (H, Wh, Cin)
    c1 = x_ref[:, pl.ds(1, Wh, stride=2), :]
    xw = jnp.maximum(c0, c1)
    xr = xw.reshape(Hh, 2, Wh, cin)                   # splits leading dim only
    pooled = jnp.maximum(xr[:, 0], xr[:, 1])          # (Hh, Wh, Cin)

    # ---- scatter pooled rows into the zero-padded flat layout
    #      (row (y+1)*Wp + (x+1) holds pooled[y, x]; the border stays 0). ----
    z_scr[...] = jnp.zeros(z_scr.shape, jnp.float32)
    for y in range(Hh):
        r = (y + 1) * Wp + 1
        z_scr[r:r + Wh, :] = pooled[y]

    # ---- in-kernel im2col: 9 shifted slices -> 9 accumulated MXU dots. ----
    acc = jnp.zeros((T, w_ref.shape[-1]), jnp.float32)
    for k in range(9):
        dy, dx = divmod(k, 3)
        tap = z_scr[dy * Wp + dx: dy * Wp + dx + T, :].astype(MXU_DTYPE)
        acc = acc + jnp.dot(tap, w_ref[k], preferred_element_type=jnp.float32)

    # Zero the wrap-around rows (x >= Wh): they become the zero padding of the
    # next conv and must not contribute to the BN statistics.
    acc = acc * m_ref[...]

    y_b = acc.astype(y_ref.dtype)
    y_ref[...] = y_b
    y_f = y_b.astype(jnp.float32)                     # stats consistent w/ what is stored
    sum_ref[...] = jnp.sum(y_f, axis=0, keepdims=True)
    ssq_ref[...] = jnp.sum(y_f * y_f, axis=0, keepdims=True)


def _bn_relu_conv_stats_kernel(y1_ref, sc_ref, sh_ref, w_ref, m_ref,
                               y2_ref, sum_ref, ssq_ref, a_scr, *, Wp, T):
    """BN1(+ReLU) applied on the fly, then Conv3x3(pad=1) + BN2 partials."""
    a = jnp.maximum(
        y1_ref[...].astype(jnp.float32) * sc_ref[...] + sh_ref[...], 0.0)
    a = a * m_ref[...]                                # re-zero padding rows

    a_scr[...] = jnp.zeros(a_scr.shape, jnp.float32)
    a_scr[Wp + 1: Wp + 1 + T, :] = a                  # rebuild padded layout

    acc = jnp.zeros((T, w_ref.shape[-1]), jnp.float32)
    for k in range(9):
        dy, dx = divmod(k, 3)
        tap = a_scr[dy * Wp + dx: dy * Wp + dx + T, :].astype(MXU_DTYPE)
        acc = acc + jnp.dot(tap, w_ref[k], preferred_element_type=jnp.float32)

    acc = acc * m_ref[...]
    y_b = acc.astype(y2_ref.dtype)
    y2_ref[...] = y_b
    y_f = y_b.astype(jnp.float32)
    sum_ref[...] = jnp.sum(y_f, axis=0, keepdims=True)
    ssq_ref[...] = jnp.sum(y_f * y_f, axis=0, keepdims=True)


def _bn_relu_kernel(y_ref, sc_ref, sh_ref, o_ref):
    o_ref[...] = jnp.maximum(
        y_ref[...].astype(jnp.float32) * sc_ref[...] + sh_ref[...], 0.0
    ).astype(o_ref.dtype)


# ------------------------------- JAX wrapper ---------------------------------

def _batch_stats_to_affine(total_sum, total_ssq, count, gamma_p, beta_p):
    mean = total_sum / count
    var = jnp.maximum(total_ssq / count - mean * mean, 0.0)   # biased, as PyTorch train-mode
    scale = gamma_p * lax.rsqrt(var + EPS)
    shift = beta_p - mean * scale
    return scale, shift


def down_forward(x_nchw, params):
    """Down.forward: MaxPool2d(2) then (Conv3x3 -> BN(batch stats) -> ReLU) * 2."""
    N, Cin, H, W = x_nchw.shape
    assert H % 2 == 0 and W % 2 == 0
    Hh, Wh = H // 2, W // 2
    Wp = Wh + 2                                # padded row width of the flat layout
    T = Hh * Wp                                # conv-output rows per image (incl. wrap rows)
    S = _round_up((Hh + 2) * Wp + 2, 8)        # flat padded-input rows per image

    Cmid = params["w1"].shape[0]
    Cout = params["w2"].shape[0]
    C1p = _round_up(Cmid, LANE)
    C2p = _round_up(Cout, LANE)

    # ---- parameter prep (tiny).  Conv bias is dropped on purpose: it is
    #      exactly cancelled by the training-mode BN mean subtraction. ----
    def prep_w(w, cin_p, cout_p):
        cout, cin = w.shape[0], w.shape[1]
        w = jnp.transpose(w, (2, 3, 1, 0)).reshape(9, cin, cout)
        w = jnp.pad(w, ((0, 0), (0, cin_p - cin), (0, cout_p - cout)))
        return w.astype(MXU_DTYPE)

    w1 = prep_w(params["w1"], Cin, C1p)        # (9, Cin,  C1p)
    w2 = prep_w(params["w2"], C1p, C2p)        # (9, C1p, C2p)
    g1 = _pad_lanes(params["g1"], C1p).reshape(1, C1p).astype(jnp.float32)
    b1 = _pad_lanes(params["be1"], C1p).reshape(1, C1p).astype(jnp.float32)
    g2 = _pad_lanes(params["g2"], C2p).reshape(1, C2p).astype(jnp.float32)
    b2 = _pad_lanes(params["be2"], C2p).reshape(1, C2p).astype(jnp.float32)

    x_nhwc = jnp.transpose(x_nchw, (0, 2, 3, 1))
    valid = ((jnp.arange(T, dtype=jnp.int32) % Wp) < Wh)
    valid = valid.astype(jnp.float32).reshape(T, 1)

    parallel = pltpu.CompilerParams(dimension_semantics=("parallel",))
    count = float(N * Hh * Wh)

    # ---- stage 1: fused maxpool + conv1 + BN1 partial statistics ----
    k1 = functools.partial(_pool_conv_stats_kernel, Hh=Hh, Wh=Wh, Wp=Wp, T=T)
    y1, s1, ss1 = pl.pallas_call(
        k1,
        grid=(N,),
        in_specs=[
            pl.BlockSpec((None, H, W, Cin), lambda n: (n, 0, 0, 0)),
            pl.BlockSpec((9, Cin, C1p), lambda n: (0, 0, 0)),
            pl.BlockSpec((T, 1), lambda n: (0, 0)),
        ],
        out_specs=[
            pl.BlockSpec((None, T, C1p), lambda n: (n, 0, 0)),
            pl.BlockSpec((None, 1, C1p), lambda n: (n, 0, 0)),
            pl.BlockSpec((None, 1, C1p), lambda n: (n, 0, 0)),
        ],
        out_shape=[
            jax.ShapeDtypeStruct((N, T, C1p), MXU_DTYPE),
            jax.ShapeDtypeStruct((N, 1, C1p), jnp.float32),
            jax.ShapeDtypeStruct((N, 1, C1p), jnp.float32),
        ],
        scratch_shapes=[pltpu.VMEM((S, Cin), jnp.float32)],
        compiler_params=parallel,
    )(x_nhwc, w1, valid)

    scale1, shift1 = _batch_stats_to_affine(
        jnp.sum(s1, axis=0), jnp.sum(ss1, axis=0), count, g1, b1)

    # ---- stage 2: BN1+ReLU (on the fly) + conv2 + BN2 partial statistics ----
    k2 = functools.partial(_bn_relu_conv_stats_kernel, Wp=Wp, T=T)
    y2, s2, ss2 = pl.pallas_call(
        k2,
        grid=(N,),
        in_specs=[
            pl.BlockSpec((None, T, C1p), lambda n: (n, 0, 0)),
            pl.BlockSpec((1, C1p), lambda n: (0, 0)),
            pl.BlockSpec((1, C1p), lambda n: (0, 0)),
            pl.BlockSpec((9, C1p, C2p), lambda n: (0, 0, 0)),
            pl.BlockSpec((T, 1), lambda n: (0, 0)),
        ],
        out_specs=[
            pl.BlockSpec((None, T, C2p), lambda n: (n, 0, 0)),
            pl.BlockSpec((None, 1, C2p), lambda n: (n, 0, 0)),
            pl.BlockSpec((None, 1, C2p), lambda n: (n, 0, 0)),
        ],
        out_shape=[
            jax.ShapeDtypeStruct((N, T, C2p), MXU_DTYPE),
            jax.ShapeDtypeStruct((N, 1, C2p), jnp.float32),
            jax.ShapeDtypeStruct((N, 1, C2p), jnp.float32),
        ],
        scratch_shapes=[pltpu.VMEM((S, C1p), jnp.float32)],
        compiler_params=parallel,
    )(y1, scale1, shift1, w2, valid)

    scale2, shift2 = _batch_stats_to_affine(
        jnp.sum(s2, axis=0), jnp.sum(ss2, axis=0), count, g2, b2)

    # ---- stage 3: final BN2 + ReLU (elementwise, lane-dense blocks) ----
    y3 = pl.pallas_call(
        _bn_relu_kernel,
        grid=(N,),
        in_specs=[
            pl.BlockSpec((None, T, C2p), lambda n: (n, 0, 0)),
            pl.BlockSpec((1, C2p), lambda n: (0, 0)),
            pl.BlockSpec((1, C2p), lambda n: (0, 0)),
        ],
        out_specs=pl.BlockSpec((None, T, C2p), lambda n: (n, 0, 0)),
        out_shape=jax.ShapeDtypeStruct((N, T, C2p), jnp.float32),
        compiler_params=parallel,
    )(y2, scale2, shift2)

    # ---- layout epilogue (pure glue): drop wrap columns + padded lanes, NCHW ----
    out = y3.reshape(N, Hh, Wp, C2p)[:, :, :Wh, :Cout]
    return jnp.transpose(out, (0, 3, 1, 2))


# ----------------------------- pure-JAX reference ----------------------------

def ref_down(x, p):
    pooled = lax.reduce_window(x, -jnp.inf, lax.max,
                               (1, 1, 2, 2), (1, 1, 2, 2), "VALID")

    def block(h, w, b, g, be):
        y = lax.conv_general_dilated(
            h, w, (1, 1), ((1, 1), (1, 1)),
            dimension_numbers=("NCHW", "OIHW", "NCHW"))
        y = y + b[None, :, None, None]
        m = jnp.mean(y, axis=(0, 2, 3), keepdims=True)
        v = jnp.mean(jnp.square(y - m), axis=(0, 2, 3), keepdims=True)
        y = (y - m) * lax.rsqrt(v + EPS)
        y = y * g[None, :, None, None] + be[None, :, None, None]
        return jnp.maximum(y, 0.0)

    h = block(pooled, p["w1"], p["b1"], p["g1"], p["be1"])
    h = block(h, p["w2"], p["b2"], p["g2"], p["be2"])
    return h


# ----------------------------------- main ------------------------------------

if __name__ == "__main__":
    key = jax.random.PRNGKey(0)
    N, Cin, Cout, Hs, Ws = 2, 4, 8, 16, 16

    ks = jax.random.split(key, 9)
    params = {
        "w1": 0.1 * jax.random.normal(ks[0], (Cout, Cin, 3, 3), jnp.float32),
        "b1": 0.1 * jax.random.normal(ks[1], (Cout,), jnp.float32),
        "g1": 1.0 + 0.1 * jax.random.normal(ks[2], (Cout,), jnp.float32),
        "be1": 0.1 * jax.random.normal(ks[3], (Cout,), jnp.float32),
        "w2": 0.1 * jax.random.normal(ks[4], (Cout, Cout, 3, 3), jnp.float32),
        "b2": 0.1 * jax.random.normal(ks[5], (Cout,), jnp.float32),
        "g2": 1.0 + 0.1 * jax.random.normal(ks[6], (Cout,), jnp.float32),
        "be2": 0.1 * jax.random.normal(ks[7], (Cout,), jnp.float32),
    }
    x = jax.random.normal(ks[8], (N, Cin, Hs, Ws), jnp.float32)

    out = jax.jit(down_forward)(x, params)
    out = jax.block_until_ready(out)

    ref = ref_down(x, params)
    assert out.shape == (N, Cout, Hs // 2, Ws // 2), out.shape
    # Tolerance sized for bf16 MXU inputs (f32 accumulation, f32 BatchNorm).
    assert jnp.allclose(out, ref, atol=3e-2, rtol=3e-2), \
        float(jnp.max(jnp.abs(out - ref)))

    print("KERNEL_OK")
</pallas_src>

<mosaic_0001>
module attributes {stable_mosaic.version = 11 : i64} {
  func.func @_pool_conv_stats_kernel(%arg0: i32, %arg1: memref<1x16x16x4xf32, #tpu.memory_space<vmem>>, %arg2: memref<9x4x128xbf16, #tpu.memory_space<vmem>>, %arg3: memref<80x1xf32, #tpu.memory_space<vmem>>, %arg4: memref<1x80x128xbf16, #tpu.memory_space<vmem>>, %arg5: memref<1x1x128xf32, #tpu.memory_space<vmem>>, %arg6: memref<1x1x128xf32, #tpu.memory_space<vmem>>, %arg7: memref<104x4xf32, #tpu.memory_space<vmem>>) attributes {dimension_semantics = [#tpu.dimension_semantics<parallel>], iteration_bounds = array<i64: 2>, scalar_prefetch = 0 : i64, scratch_operands = 1 : i64, tpu.core_type = #tpu.core_type<tc>, window_params = [{transform_indices = @transform_0, window_bounds = array<i64: 1, 16, 16, 4>}, {pipeline_mode = #tpu.pipeline_mode<synchronous>, transform_indices = @transform_1, window_bounds = array<i64: 9, 4, 128>}, {pipeline_mode = #tpu.pipeline_mode<synchronous>, transform_indices = @transform_2, window_bounds = array<i64: 80, 1>}, {transform_indices = @transform_3, window_bounds = array<i64: 1, 80, 128>}, {transform_indices = @transform_4, window_bounds = array<i64: 1, 1, 128>}, {transform_indices = @transform_5, window_bounds = array<i64: 1, 1, 128>}]} {
    %c0 = arith.constant 0 : index
    %c0_0 = arith.constant 0 : index
    %c0_1 = arith.constant 0 : index
    %c0_2 = arith.constant 0 : index
    %0 = tpu.strided_load %arg1[%c0, %c0_0, %c0_1, %c0_2] {strides = array<i32: 1, 1, 2, 1>} : memref<1x16x16x4xf32, #tpu.memory_space<vmem>>, vector<1x16x8x4xf32>
    %1 = vector.shape_cast %0 : vector<1x16x8x4xf32> to vector<16x8x4xf32>
    %c0_3 = arith.constant 0 : index
    %c0_4 = arith.constant 0 : index
    %c1 = arith.constant 1 : index
    %c0_5 = arith.constant 0 : index
    %2 = tpu.strided_load %arg1[%c0_3, %c0_4, %c1, %c0_5] {strides = array<i32: 1, 1, 2, 1>} : memref<1x16x16x4xf32, #tpu.memory_space<vmem>>, vector<1x16x8x4xf32>
    %3 = vector.shape_cast %2 : vector<1x16x8x4xf32> to vector<16x8x4xf32>
    %4 = arith.maximumf %1, %3 : vector<16x8x4xf32>
    %5 = vector.shape_cast %4 : vector<16x8x4xf32> to vector<8x2x8x4xf32>
    %6 = vector.extract_strided_slice %5 {offsets = [0, 0, 0, 0], sizes = [8, 1, 8, 4], strides = [1, 1, 1, 1]} : vector<8x2x8x4xf32> to vector<8x1x8x4xf32>
    %7 = vector.shape_cast %6 : vector<8x1x8x4xf32> to vector<8x8x4xf32>
    %8 = vector.extract_strided_slice %5 {offsets = [0, 1, 0, 0], sizes = [8, 1, 8, 4], strides = [1, 1, 1, 1]} : vector<8x2x8x4xf32> to vector<8x1x8x4xf32>
    %9 = vector.shape_cast %8 : vector<8x1x8x4xf32> to vector<8x8x4xf32>
    %10 = arith.maximumf %7, %9 : vector<8x8x4xf32>
    %cst = arith.constant 0.000000e+00 : f32
    %11 = vector.broadcast %cst : f32 to vector<104x4xf32>
    %c0_6 = arith.constant 0 : index
    %c0_7 = arith.constant 0 : index
    %12 = vector.load %arg7[%c0_6, %c0_7] : memref<104x4xf32, #tpu.memory_space<vmem>>, vector<104x4xf32>
    tpu.vector_store %arg7[%c0_6, %c0_7], %11 {strides = array<i32>} : memref<104x4xf32, #tpu.memory_space<vmem>>, vector<104x4xf32>,
    %13 = vector.extract_strided_slice %10 {offsets = [0, 0, 0], sizes = [1, 8, 4], strides = [1, 1, 1]} : vector<8x8x4xf32> to vector<1x8x4xf32>
    %14 = vector.shape_cast %13 : vector<1x8x4xf32> to vector<8x4xf32>
    %c11 = arith.constant 11 : index
    %c0_8 = arith.constant 0 : index
    %15 = vector.load %arg7[%c11, %c0_8] : memref<104x4xf32, #tpu.memory_space<vmem>>, vector<8x4xf32>
    tpu.vector_store %arg7[%c11, %c0_8], %14 {strides = array<i32>} : memref<104x4xf32, #tpu.memory_space<vmem>>, vector<8x4xf32>,
    %16 = vector.extract_strided_slice %10 {offsets = [1, 0, 0], sizes = [1, 8, 4], strides = [1, 1, 1]} : vector<8x8x4xf32> to vector<1x8x4xf32>
    %17 = vector.shape_cast %16 : vector<1x8x4xf32> to vector<8x4xf32>
    %c21 = arith.constant 21 : index
    %c0_9 = arith.constant 0 : index
    %18 = vector.load %arg7[%c21, %c0_9] : memref<104x4xf32, #tpu.memory_space<vmem>>, vector<8x4xf32>
    tpu.vector_store %arg7[%c21, %c0_9], %17 {strides = array<i32>} : memref<104x4xf32, #tpu.memory_space<vmem>>, vector<8x4xf32>,
    %19 = vector.extract_strided_slice %10 {offsets = [2, 0, 0], sizes = [1, 8, 4], strides = [1, 1, 1]} : vector<8x8x4xf32> to vector<1x8x4xf32>
    %20 = vector.shape_cast %19 : vector<1x8x4xf32> to vector<8x4xf32>
    %c31 = arith.constant 31 : index
    %c0_10 = arith.constant 0 : index
    %21 = vector.load %arg7[%c31, %c0_10] : memref<104x4xf32, #tpu.memory_space<vmem>>, vector<8x4xf32>
    tpu.vector_store %arg7[%c31, %c0_10], %20 {strides = array<i32>} : memref<104x4xf32, #tpu.memory_space<vmem>>, vector<8x4xf32>,
    %22 = vector.extract_strided_slice %10 {offsets = [3, 0, 0], sizes = [1, 8, 4], strides = [1, 1, 1]} : vector<8x8x4xf32> to vector<1x8x4xf32>
    %23 = vector.shape_cast %22 : vector<1x8x4xf32> to vector<8x4xf32>
    %c41 = arith.constant 41 : index
    %c0_11 = arith.constant 0 : index
    %24 = vector.load %arg7[%c41, %c0_11] : memref<104x4xf32, #tpu.memory_space<vmem>>, vector<8x4xf32>
    tpu.vector_store %arg7[%c41, %c0_11], %23 {strides = array<i32>} : memref<104x4xf32, #tpu.memory_space<vmem>>, vector<8x4xf32>,
    %25 = vector.extract_strided_slice %10 {offsets = [4, 0, 0], sizes = [1, 8, 4], strides = [1, 1, 1]} : vector<8x8x4xf32> to vector<1x8x4xf32>
    %26 = vector.shape_cast %25 : vector<1x8x4xf32> to vector<8x4xf32>
    %c51 = arith.constant 51 : index
    %c0_12 = arith.constant 0 : index
    %27 = vector.load %arg7[%c51, %c0_12] : memref<104x4xf32, #tpu.memory_space<vmem>>, vector<8x4xf32>
    tpu.vector_store %arg7[%c51, %c0_12], %26 {strides = array<i32>} : memref<104x4xf32, #tpu.memory_space<vmem>>, vector<8x4xf32>,
    %28 = vector.extract_strided_slice %10 {offsets = [5, 0, 0], sizes = [1, 8, 4], strides = [1, 1, 1]} : vector<8x8x4xf32> to vector<1x8x4xf32>
    %29 = vector.shape_cast %28 : vector<1x8x4xf32> to vector<8x4xf32>
    %c61 = arith.constant 61 : index
    %c0_13 = arith.constant 0 : index
    %30 = vector.load %arg7[%c61, %c0_13] : memref<104x4xf32, #tpu.memory_space<vmem>>, vector<8x4xf32>
    tpu.vector_store %arg7[%c61, %c0_13], %29 {strides = array<i32>} : memref<104x4xf32, #tpu.memory_space<vmem>>, vector<8x4xf32>,
    %31 = vector.extract_strided_slice %10 {offsets = [6, 0, 0], sizes = [1, 8, 4], strides = [1, 1, 1]} : vector<8x8x4xf32> to vector<1x8x4xf32>
    %32 = vector.shape_cast %31 : vector<1x8x4xf32> to vector<8x4xf32>
    %c71 = arith.constant 71 : index
    %c0_14 = arith.constant 0 : index
    %33 = vector.load %arg7[%c71, %c0_14] : memref<104x4xf32, #tpu.memory_space<vmem>>, vector<8x4xf32>
    tpu.vector_store %arg7[%c71, %c0_14], %32 {strides = array<i32>} : memref<104x4xf32, #tpu.memory_space<vmem>>, vector<8x4xf32>,
    %34 = vector.extract_strided_slice %10 {offsets = [7, 0, 0], sizes = [1, 8, 4], strides = [1, 1, 1]} : vector<8x8x4xf32> to vector<1x8x4xf32>
    %35 = vector.shape_cast %34 : vector<1x8x4xf32> to vector<8x4xf32>
    %c81 = arith.constant 81 : index
    %c0_15 = arith.constant 0 : index
    %36 = vector.load %arg7[%c81, %c0_15] : memref<104x4xf32, #tpu.memory_space<vmem>>, vector<8x4xf32>
    tpu.vector_store %arg7[%c81, %c0_15], %35 {strides = array<i32>} : memref<104x4xf32, #tpu.memory_space<vmem>>, vector<8x4xf32>,
    %cst_16 = arith.constant 0.000000e+00 : f32
    %37 = vector.broadcast %cst_16 : f32 to vector<80x128xf32>
    %c0_17 = arith.constant 0 : index
    %c0_18 = arith.constant 0 : index
    %38 = vector.load %arg7[%c0_17, %c0_18] : memref<104x4xf32, #tpu.memory_space<vmem>>, vector<80x4xf32>
    %39 = arith.truncf %38 : vector<80x4xf32> to vector<80x4xbf16>
    %c0_19 = arith.constant 0 : index
    %c0_20 = arith.constant 0 : index
    %c0_21 = arith.constant 0 : index
    %40 = vector.load %arg2[%c0_19, %c0_20, %c0_21] : memref<9x4x128xbf16, #tpu.memory_space<vmem>>, vector<1x4x128xbf16>
    %41 = vector.shape_cast %40 : vector<1x4x128xbf16> to vector<4x128xbf16>
    %cst_22 = arith.constant dense<0.000000e+00> : vector<80x128xf32>
    %42 = tpu.matmul %39, %41, %cst_22 {dimension_numbers = #tpu.dot_dimension_numbers<[1], [0], [0], [1], [0, 0, 1, 1], [], []>} : vector<80x4xbf16>, vector<4x128xbf16>, vector<80x128xf32> -> vector<80x128xf32>
    %43 = arith.addf %37, %42 : vector<80x128xf32>
    %c1_23 = arith.constant 1 : index
    %c0_24 = arith.constant 0 : index
    %44 = vector.load %arg7[%c1_23, %c0_24] : memref<104x4xf32, #tpu.memory_space<vmem>>, vector<80x4xf32>
    %45 = arith.truncf %44 : vector<80x4xf32> to vector<80x4xbf16>
    %c1_25 = arith.constant 1 : index
    %c0_26 = arith.constant 0 : index
    %c0_27 = arith.constant 0 : index
    %46 = vector.load %arg2[%c1_25, %c0_26, %c0_27] : memref<9x4x128xbf16, #tpu.memory_space<vmem>>, vector<1x4x128xbf16>
    %47 = vector.shape_cast %46 : vector<1x4x128xbf16> to vector<4x128xbf16>
    %cst_28 = arith.constant dense<0.000000e+00> : vector<80x128xf32>
    %48 = tpu.matmul %45, %47, %cst_28 {dimension_numbers = #tpu.dot_dimension_numbers<[1], [0], [0], [1], [0, 0, 1, 1], [], []>} : vector<80x4xbf16>, vector<4x128xbf16>, vector<80x128xf32> -> vector<80x128xf32>
    %49 = arith.addf %43, %48 : vector<80x128xf32>
    %c2 = arith.constant 2 : index
    %c0_29 = arith.constant 0 : index
    %50 = vector.load %arg7[%c2, %c0_29] : memref<104x4xf32, #tpu.memory_space<vmem>>, vector<80x4xf32>
    %51 = arith.truncf %50 : vector<80x4xf32> to vector<80x4xbf16>
    %c2_30 = arith.constant 2 : index
    %c0_31 = arith.constant 0 : index
    %c0_32 = arith.constant 0 : index
    %52 = vector.load %arg2[%c2_30, %c0_31, %c0_32] : memref<9x4x128xbf16, #tpu.memory_space<vmem>>, vector<1x4x128xbf16>
    %53 = vector.shape_cast %52 : vector<1x4x128xbf16> to vector<4x128xbf16>
    %cst_33 = arith.constant dense<0.000000e+00> : vector<80x128xf32>
    %54 = tpu.matmul %51, %53, %cst_33 {dimension_numbers = #tpu.dot_dimension_numbers<[1], [0], [0], [1], [0, 0, 1, 1], [], []>} : vector<80x4xbf16>, vector<4x128xbf16>, vector<80x128xf32> -> vector<80x128xf32>
    %55 = arith.addf %49, %54 : vector<80x128xf32>
    %c10 = arith.constant 10 : index
    %c0_34 = arith.constant 0 : index
    %56 = vector.load %arg7[%c10, %c0_34] : memref<104x4xf32, #tpu.memory_space<vmem>>, vector<80x4xf32>
    %57 = arith.truncf %56 : vector<80x4xf32> to vector<80x4xbf16>
    %c3 = arith.constant 3 : index
    %c0_35 = arith.constant 0 : index
    %c0_36 = arith.constant 0 : index
    %58 = vector.load %arg2[%c3, %c0_35, %c0_36] : memref<9x4x128xbf16, #tpu.memory_space<vmem>>, vector<1x4x128xbf16>
    %59 = vector.shape_cast %58 : vector<1x4x128xbf16> to vector<4x128xbf16>
    %cst_37 = arith.constant dense<0.000000e+00> : vector<80x128xf32>
    %60 = tpu.matmul %57, %59, %cst_37 {dimension_numbers = #tpu.dot_dimension_numbers<[1], [0], [0], [1], [0, 0, 1, 1], [], []>} : vector<80x4xbf16>, vector<4x128xbf16>, vector<80x128xf32> -> vector<80x128xf32>
    %61 = arith.addf %55, %60 : vector<80x128xf32>
    %c11_38 = arith.constant 11 : index
    %c0_39 = arith.constant 0 : index
    %62 = vector.load %arg7[%c11_38, %c0_39] : memref<104x4xf32, #tpu.memory_space<vmem>>, vector<80x4xf32>
    %63 = arith.truncf %62 : vector<80x4xf32> to vector<80x4xbf16>
    %c4 = arith.constant 4 : index
    %c0_40 = arith.constant 0 : index
    %c0_41 = arith.constant 0 : index
    %64 = vector.load %arg2[%c4, %c0_40, %c0_41] : memref<9x4x128xbf16, #tpu.memory_space<vmem>>, vector<1x4x128xbf16>
    %65 = vector.shape_cast %64 : vector<1x4x128xbf16> to vector<4x128xbf16>
    %cst_42 = arith.constant dense<0.000000e+00> : vector<80x128xf32>
    %66 = tpu.matmul %63, %65, %cst_42 {dimension_numbers = #tpu.dot_dimension_numbers<[1], [0], [0], [1], [0, 0, 1, 1], [], []>} : vector<80x4xbf16>, vector<4x128xbf16>, vector<80x128xf32> -> vector<80x128xf32>
    %67 = arith.addf %61, %66 : vector<80x128xf32>
    %c12 = arith.constant 12 : index
    %c0_43 = arith.constant 0 : index
    %68 = vector.load %arg7[%c12, %c0_43] : memref<104x4xf32, #tpu.memory_space<vmem>>, vector<80x4xf32>
    %69 = arith.truncf %68 : vector<80x4xf32> to vector<80x4xbf16>
    %c5 = arith.constant 5 : index
    %c0_44 = arith.constant 0 : index
    %c0_45 = arith.constant 0 : index
    %70 = vector.load %arg2[%c5, %c0_44, %c0_45] : memref<9x4x128xbf16, #tpu.memory_space<vmem>>, vector<1x4x128xbf16>
    %71 = vector.shape_cast %70 : vector<1x4x128xbf16> to vector<4x128xbf16>
    %cst_46 = arith.constant dense<0.000000e+00> : vector<80x128xf32>
    %72 = tpu.matmul %69, %71, %cst_46 {dimension_numbers = #tpu.dot_dimension_numbers<[1], [0], [0], [1], [0, 0, 1, 1], [], []>} : vector<80x4xbf16>, vector<4x128xbf16>, vector<80x128xf32> -> vector<80x128xf32>
    %73 = arith.addf %67, %72 : vector<80x128xf32>
    %c20 = arith.constant 20 : index
    %c0_47 = arith.constant 0 : index
    %74 = vector.load %arg7[%c20, %c0_47] : memref<104x4xf32, #tpu.memory_space<vmem>>, vector<80x4xf32>
    %75 = arith.truncf %74 : vector<80x4xf32> to vector<80x4xbf16>
    %c6 = arith.constant 6 : index
    %c0_48 = arith.constant 0 : index
    %c0_49 = arith.constant 0 : index
    %76 = vector.load %arg2[%c6, %c0_48, %c0_49] : memref<9x4x128xbf16, #tpu.memory_space<vmem>>, vector<1x4x128xbf16>
    %77 = vector.shape_cast %76 : vector<1x4x128xbf16> to vector<4x128xbf16>
    %cst_50 = arith.constant dense<0.000000e+00> : vector<80x128xf32>
    %78 = tpu.matmul %75, %77, %cst_50 {dimension_numbers = #tpu.dot_dimension_numbers<[1], [0], [0], [1], [0, 0, 1, 1], [], []>} : vector<80x4xbf16>, vector<4x128xbf16>, vector<80x128xf32> -> vector<80x128xf32>
    %79 = arith.addf %73, %78 : vector<80x128xf32>
    %c21_51 = arith.constant 21 : index
    %c0_52 = arith.constant 0 : index
    %80 = vector.load %arg7[%c21_51, %c0_52] : memref<104x4xf32, #tpu.memory_space<vmem>>, vector<80x4xf32>
    %81 = arith.truncf %80 : vector<80x4xf32> to vector<80x4xbf16>
    %c7 = arith.constant 7 : index
    %c0_53 = arith.constant 0 : index
    %c0_54 = arith.constant 0 : index
    %82 = vector.load %arg2[%c7, %c0_53, %c0_54] : memref<9x4x128xbf16, #tpu.memory_space<vmem>>, vector<1x4x128xbf16>
    %83 = vector.shape_cast %82 : vector<1x4x128xbf16> to vector<4x128xbf16>
    %cst_55 = arith.constant dense<0.000000e+00> : vector<80x128xf32>
    %84 = tpu.matmul %81, %83, %cst_55 {dimension_numbers = #tpu.dot_dimension_numbers<[1], [0], [0], [1], [0, 0, 1, 1], [], []>} : vector<80x4xbf16>, vector<4x128xbf16>, vector<80x128xf32> -> vector<80x128xf32>
    %85 = arith.addf %79, %84 : vector<80x128xf32>
    %c22 = arith.constant 22 : index
    %c0_56 = arith.constant 0 : index
    %86 = vector.load %arg7[%c22, %c0_56] : memref<104x4xf32, #tpu.memory_space<vmem>>, vector<80x4xf32>
    %87 = arith.truncf %86 : vector<80x4xf32> to vector<80x4xbf16>
    %c8 = arith.constant 8 : index
    %c0_57 = arith.constant 0 : index
    %c0_58 = arith.constant 0 : index
    %88 = vector.load %arg2[%c8, %c0_57, %c0_58] : memref<9x4x128xbf16, #tpu.memory_space<vmem>>, vector<1x4x128xbf16>
    %89 = vector.shape_cast %88 : vector<1x4x128xbf16> to vector<4x128xbf16>
    %cst_59 = arith.constant dense<0.000000e+00> : vector<80x128xf32>
    %90 = tpu.matmul %87, %89, %cst_59 {dimension_numbers = #tpu.dot_dimension_numbers<[1], [0], [0], [1], [0, 0, 1, 1], [], []>} : vector<80x4xbf16>, vector<4x128xbf16>, vector<80x128xf32> -> vector<80x128xf32>
    %91 = arith.addf %85, %90 : vector<80x128xf32>
    %c0_60 = arith.constant 0 : index
    %c0_61 = arith.constant 0 : index
    %92 = vector.load %arg3[%c0_60, %c0_61] : memref<80x1xf32, #tpu.memory_space<vmem>>, vector<80x1xf32>
    %93 = vector.broadcast %92 : vector<80x1xf32> to vector<80x128xf32>
    %94 = arith.mulf %91, %93 : vector<80x128xf32>
    %95 = arith.truncf %94 : vector<80x128xf32> to vector<80x128xbf16>
    %c0_62 = arith.constant 0 : index
    %c0_63 = arith.constant 0 : index
    %c0_64 = arith.constant 0 : index
    %96 = vector.load %arg4[%c0_62, %c0_63, %c0_64] : memref<1x80x128xbf16, #tpu.memory_space<vmem>>, vector<1x80x128xbf16>
    %97 = vector.shape_cast %96 : vector<1x80x128xbf16> to vector<80x128xbf16>
    %98 = vector.shape_cast %95 : vector<80x128xbf16> to vector<1x80x128xbf16>
    tpu.vector_store %arg4[%c0_62, %c0_63, %c0_64], %98 {strides = array<i32>} : memref<1x80x128xbf16, #tpu.memory_space<vmem>>, vector<1x80x128xbf16>,
    %99 = arith.extf %95 : vector<80x128xbf16> to vector<80x128xf32>
    %cst_65 = arith.constant dense<0.000000e+00> : vector<128xf32>
    %100 = vector.multi_reduction <add>, %99, %cst_65 [0] : vector<80x128xf32> to vector<128xf32>
    %101 = vector.shape_cast %100 : vector<128xf32> to vector<1x128xf32>
    %c0_66 = arith.constant 0 : index
    %c0_67 = arith.constant 0 : index
    %c0_68 = arith.constant 0 : index
    %102 = vector.load %arg5[%c0_66, %c0_67, %c0_68] : memref<1x1x128xf32, #tpu.memory_space<vmem>>, vector<1x1x128xf32>
    %103 = vector.shape_cast %102 : vector<1x1x128xf32> to vector<1x128xf32>
    %104 = vector.shape_cast %101 : vector<1x128xf32> to vector<1x1x128xf32>
    tpu.vector_store %arg5[%c0_66, %c0_67, %c0_68], %104 {strides = array<i32>} : memref<1x1x128xf32, #tpu.memory_space<vmem>>, vector<1x1x128xf32>,
    %105 = arith.mulf %99, %99 : vector<80x128xf32>
    %cst_69 = arith.constant dense<0.000000e+00> : vector<128xf32>
    %106 = vector.multi_reduction <add>, %105, %cst_69 [0] : vector<80x128xf32> to vector<128xf32>
    %107 = vector.shape_cast %106 : vector<128xf32> to vector<1x128xf32>
    %c0_70 = arith.constant 0 : index
    %c0_71 = arith.constant 0 : index
    %c0_72 = arith.constant 0 : index
    %108 = vector.load %arg6[%c0_70, %c0_71, %c0_72] : memref<1x1x128xf32, #tpu.memory_space<vmem>>, vector<1x1x128xf32>
    %109 = vector.shape_cast %108 : vector<1x1x128xf32> to vector<1x128xf32>
    %110 = vector.shape_cast %107 : vector<1x128xf32> to vector<1x1x128xf32>
    tpu.vector_store %arg6[%c0_70, %c0_71, %c0_72], %110 {strides = array<i32>} : memref<1x1x128xf32, #tpu.memory_space<vmem>>, vector<1x1x128xf32>,
    return
  }
  func.func @transform_0(%arg0: i32) -> (i32, i32, i32, i32) {
    %c0_i32 = arith.constant 0 : i32
    %c0_i32_0 = arith.constant 0 : i32
    %c0_i32_1 = arith.constant 0 : i32
    %c0_i32_2 = arith.constant 0 : i32
    return %arg0, %c0_i32, %c0_i32_0, %c0_i32_1 : i32, i32, i32, i32
  }
  func.func @transform_1(%arg0: i32) -> (i32, i32, i32) {
    %c0_i32 = arith.constant 0 : i32
    %c0_i32_0 = arith.constant 0 : i32
    %c0_i32_1 = arith.constant 0 : i32
    %c0_i32_2 = arith.constant 0 : i32
    return %c0_i32, %c0_i32_0, %c0_i32_1 : i32, i32, i32
  }
  func.func @transform_2(%arg0: i32) -> (i32, i32) {
    %c0_i32 = arith.constant 0 : i32
    %c0_i32_0 = arith.constant 0 : i32
    %c0_i32_1 = arith.constant 0 : i32
    return %c0_i32, %c0_i32_0 : i32, i32
  }
  func.func @transform_3(%arg0: i32) -> (i32, i32, i32) {
    %c0_i32 = arith.constant 0 : i32
    %c0_i32_0 = arith.constant 0 : i32
    %c0_i32_1 = arith.constant 0 : i32
    return %arg0, %c0_i32, %c0_i32_0 : i32, i32, i32
  }
  func.func @transform_4(%arg0: i32) -> (i32, i32, i32) {
    %c0_i32 = arith.constant 0 : i32
    %c0_i32_0 = arith.constant 0 : i32
    %c0_i32_1 = arith.constant 0 : i32
    return %arg0, %c0_i32, %c0_i32_0 : i32, i32, i32
  }
  func.func @transform_5(%arg0: i32) -> (i32, i32, i32) {
    %c0_i32 = arith.constant 0 : i32
    %c0_i32_0 = arith.constant 0 : i32
    %c0_i32_1 = arith.constant 0 : i32
    return %arg0, %c0_i32, %c0_i32_0 : i32, i32, i32
  }
}

module attributes {stable_mosaic.version = 11 : i64} {
  func.func @_bn_relu_conv_stats_kernel(%arg0: i32, %arg1: memref<1x80x128xbf16, #tpu.memory_space<vmem>>, %arg2: memref<1x128xf32, #tpu.memory_space<vmem>>, %arg3: memref<1x128xf32, #tpu.memory_space<vmem>>, %arg4: memref<9x128x128xbf16, #tpu.memory_space<vmem>>, %arg5: memref<80x1xf32, #tpu.memory_space<vmem>>, %arg6: memref<1x80x128xbf16, #tpu.memory_space<vmem>>, %arg7: memref<1x1x128xf32, #tpu.memory_space<vmem>>, %arg8: memref<1x1x128xf32, #tpu.memory_space<vmem>>, %arg9: memref<104x128xf32, #tpu.memory_space<vmem>>) attributes {dimension_semantics = [#tpu.dimension_semantics<parallel>], iteration_bounds = array<i64: 2>, scalar_prefetch = 0 : i64, scratch_operands = 1 : i64, tpu.core_type = #tpu.core_type<tc>, window_params = [{transform_indices = @transform_0, window_bounds = array<i64: 1, 80, 128>}, {pipeline_mode = #tpu.pipeline_mode<synchronous>, transform_indices = @transform_1, window_bounds = array<i64: 1, 128>}, {pipeline_mode = #tpu.pipeline_mode<synchronous>, transform_indices = @transform_2, window_bounds = array<i64: 1, 128>}, {pipeline_mode = #tpu.pipeline_mode<synchronous>, transform_indices = @transform_3, window_bounds = array<i64: 9, 128, 128>}, {pipeline_mode = #tpu.pipeline_mode<synchronous>, transform_indices = @transform_4, window_bounds = array<i64: 80, 1>}, {transform_indices = @transform_5, window_bounds = array<i64: 1, 80, 128>}, {transform_indices = @transform_6, window_bounds = array<i64: 1, 1, 128>}, {transform_indices = @transform_7, window_bounds = array<i64: 1, 1, 128>}]} {
    %c0 = arith.constant 0 : index
    %c0_0 = arith.constant 0 : index
    %c0_1 = arith.constant 0 : index
    %0 = vector.load %arg1[%c0, %c0_0, %c0_1] : memref<1x80x128xbf16, #tpu.memory_space<vmem>>, vector<1x80x128xbf16>
    %1 = vector.shape_cast %0 : vector<1x80x128xbf16> to vector<80x128xbf16>
    %2 = arith.extf %1 : vector<80x128xbf16> to vector<80x128xf32>
    %c0_2 = arith.constant 0 : index
    %c0_3 = arith.constant 0 : index
    %3 = vector.load %arg2[%c0_2, %c0_3] : memref<1x128xf32, #tpu.memory_space<vmem>>, vector<1x128xf32>
    %4 = vector.broadcast %3 : vector<1x128xf32> to vector<80x128xf32>
    %5 = arith.mulf %2, %4 : vector<80x128xf32>
    %c0_4 = arith.constant 0 : index
    %c0_5 = arith.constant 0 : index
    %6 = vector.load %arg3[%c0_4, %c0_5] : memref<1x128xf32, #tpu.memory_space<vmem>>, vector<1x128xf32>
    %7 = vector.broadcast %6 : vector<1x128xf32> to vector<80x128xf32>
    %8 = arith.addf %5, %7 : vector<80x128xf32>
    %cst = arith.constant 0.000000e+00 : f32
    %9 = vector.broadcast %cst : f32 to vector<80x128xf32>
    %10 = arith.maximumf %8, %9 : vector<80x128xf32>
    %c0_6 = arith.constant 0 : index
    %c0_7 = arith.constant 0 : index
    %11 = vector.load %arg5[%c0_6, %c0_7] : memref<80x1xf32, #tpu.memory_space<vmem>>, vector<80x1xf32>
    %12 = vector.broadcast %11 : vector<80x1xf32> to vector<80x128xf32>
    %13 = arith.mulf %10, %12 : vector<80x128xf32>
    %cst_8 = arith.constant 0.000000e+00 : f32
    %14 = vector.broadcast %cst_8 : f32 to vector<104x128xf32>
    %c0_9 = arith.constant 0 : index
    %c0_10 = arith.constant 0 : index
    %15 = vector.load %arg9[%c0_9, %c0_10] : memref<104x128xf32, #tpu.memory_space<vmem>>, vector<104x128xf32>
    tpu.vector_store %arg9[%c0_9, %c0_10], %14 {strides = array<i32>} : memref<104x128xf32, #tpu.memory_space<vmem>>, vector<104x128xf32>,
    %c11 = arith.constant 11 : index
    %c0_11 = arith.constant 0 : index
    %16 = vector.load %arg9[%c11, %c0_11] : memref<104x128xf32, #tpu.memory_space<vmem>>, vector<80x128xf32>
    tpu.vector_store %arg9[%c11, %c0_11], %13 {strides = array<i32>} : memref<104x128xf32, #tpu.memory_space<vmem>>, vector<80x128xf32>,
    %cst_12 = arith.constant 0.000000e+00 : f32
    %17 = vector.broadcast %cst_12 : f32 to vector<80x128xf32>
    %c0_13 = arith.constant 0 : index
    %c0_14 = arith.constant 0 : index
    %18 = vector.load %arg9[%c0_13, %c0_14] : memref<104x128xf32, #tpu.memory_space<vmem>>, vector<80x128xf32>
    %19 = arith.truncf %18 : vector<80x128xf32> to vector<80x128xbf16>
    %c0_15 = arith.constant 0 : index
    %c0_16 = arith.constant 0 : index
    %c0_17 = arith.constant 0 : index
    %20 = vector.load %arg4[%c0_15, %c0_16, %c0_17] : memref<9x128x128xbf16, #tpu.memory_space<vmem>>, vector<1x128x128xbf16>
    %21 = vector.shape_cast %20 : vector<1x128x128xbf16> to vector<128x128xbf16>
    %cst_18 = arith.constant dense<0.000000e+00> : vector<80x128xf32>
    %22 = tpu.matmul %19, %21, %cst_18 {dimension_numbers = #tpu.dot_dimension_numbers<[1], [0], [0], [1], [0, 0, 1, 1], [], []>} : vector<80x128xbf16>, vector<128x128xbf16>, vector<80x128xf32> -> vector<80x128xf32>
    %23 = arith.addf %17, %22 : vector<80x128xf32>
    %c1 = arith.constant 1 : index
    %c0_19 = arith.constant 0 : index
    %24 = vector.load %arg9[%c1, %c0_19] : memref<104x128xf32, #tpu.memory_space<vmem>>, vector<80x128xf32>
    %25 = arith.truncf %24 : vector<80x128xf32> to vector<80x128xbf16>
    %c1_20 = arith.constant 1 : index
    %c0_21 = arith.constant 0 : index
    %c0_22 = arith.constant 0 : index
    %26 = vector.load %arg4[%c1_20, %c0_21, %c0_22] : memref<9x128x128xbf16, #tpu.memory_space<vmem>>, vector<1x128x128xbf16>
    %27 = vector.shape_cast %26 : vector<1x128x128xbf16> to vector<128x128xbf16>
    %cst_23 = arith.constant dense<0.000000e+00> : vector<80x128xf32>
    %28 = tpu.matmul %25, %27, %cst_23 {dimension_numbers = #tpu.dot_dimension_numbers<[1], [0], [0], [1], [0, 0, 1, 1], [], []>} : vector<80x128xbf16>, vector<128x128xbf16>, vector<80x128xf32> -> vector<80x128xf32>
    %29 = arith.addf %23, %28 : vector<80x128xf32>
    %c2 = arith.constant 2 : index
    %c0_24 = arith.constant 0 : index
    %30 = vector.load %arg9[%c2, %c0_24] : memref<104x128xf32, #tpu.memory_space<vmem>>, vector<80x128xf32>
    %31 = arith.truncf %30 : vector<80x128xf32> to vector<80x128xbf16>
    %c2_25 = arith.constant 2 : index
    %c0_26 = arith.constant 0 : index
    %c0_27 = arith.constant 0 : index
    %32 = vector.load %arg4[%c2_25, %c0_26, %c0_27] : memref<9x128x128xbf16, #tpu.memory_space<vmem>>, vector<1x128x128xbf16>
    %33 = vector.shape_cast %32 : vector<1x128x128xbf16> to vector<128x128xbf16>
    %cst_28 = arith.constant dense<0.000000e+00> : vector<80x128xf32>
    %34 = tpu.matmul %31, %33, %cst_28 {dimension_numbers = #tpu.dot_dimension_numbers<[1], [0], [0], [1], [0, 0, 1, 1], [], []>} : vector<80x128xbf16>, vector<128x128xbf16>, vector<80x128xf32> -> vector<80x128xf32>
    %35 = arith.addf %29, %34 : vector<80x128xf32>
    %c10 = arith.constant 10 : index
    %c0_29 = arith.constant 0 : index
    %36 = vector.load %arg9[%c10, %c0_29] : memref<104x128xf32, #tpu.memory_space<vmem>>, vector<80x128xf32>
    %37 = arith.truncf %36 : vector<80x128xf32> to vector<80x128xbf16>
    %c3 = arith.constant 3 : index
    %c0_30 = arith.constant 0 : index
    %c0_31 = arith.constant 0 : index
    %38 = vector.load %arg4[%c3, %c0_30, %c0_31] : memref<9x128x128xbf16, #tpu.memory_space<vmem>>, vector<1x128x128xbf16>
    %39 = vector.shape_cast %38 : vector<1x128x128xbf16> to vector<128x128xbf16>
    %cst_32 = arith.constant dense<0.000000e+00> : vector<80x128xf32>
    %40 = tpu.matmul %37, %39, %cst_32 {dimension_numbers = #tpu.dot_dimension_numbers<[1], [0], [0], [1], [0, 0, 1, 1], [], []>} : vector<80x128xbf16>, vector<128x128xbf16>, vector<80x128xf32> -> vector<80x128xf32>
    %41 = arith.addf %35, %40 : vector<80x128xf32>
    %c11_33 = arith.constant 11 : index
    %c0_34 = arith.constant 0 : index
    %42 = vector.load %arg9[%c11_33, %c0_34] : memref<104x128xf32, #tpu.memory_space<vmem>>, vector<80x128xf32>
    %43 = arith.truncf %42 : vector<80x128xf32> to vector<80x128xbf16>
    %c4 = arith.constant 4 : index
    %c0_35 = arith.constant 0 : index
    %c0_36 = arith.constant 0 : index
    %44 = vector.load %arg4[%c4, %c0_35, %c0_36] : memref<9x128x128xbf16, #tpu.memory_space<vmem>>, vector<1x128x128xbf16>
    %45 = vector.shape_cast %44 : vector<1x128x128xbf16> to vector<128x128xbf16>
    %cst_37 = arith.constant dense<0.000000e+00> : vector<80x128xf32>
    %46 = tpu.matmul %43, %45, %cst_37 {dimension_numbers = #tpu.dot_dimension_numbers<[1], [0], [0], [1], [0, 0, 1, 1], [], []>} : vector<80x128xbf16>, vector<128x128xbf16>, vector<80x128xf32> -> vector<80x128xf32>
    %47 = arith.addf %41, %46 : vector<80x128xf32>
    %c12 = arith.constant 12 : index
    %c0_38 = arith.constant 0 : index
    %48 = vector.load %arg9[%c12, %c0_38] : memref<104x128xf32, #tpu.memory_space<vmem>>, vector<80x128xf32>
    %49 = arith.truncf %48 : vector<80x128xf32> to vector<80x128xbf16>
    %c5 = arith.constant 5 : index
    %c0_39 = arith.constant 0 : index
    %c0_40 = arith.constant 0 : index
    %50 = vector.load %arg4[%c5, %c0_39, %c0_40] : memref<9x128x128xbf16, #tpu.memory_space<vmem>>, vector<1x128x128xbf16>
    %51 = vector.shape_cast %50 : vector<1x128x128xbf16> to vector<128x128xbf16>
    %cst_41 = arith.constant dense<0.000000e+00> : vector<80x128xf32>
    %52 = tpu.matmul %49, %51, %cst_41 {dimension_numbers = #tpu.dot_dimension_numbers<[1], [0], [0], [1], [0, 0, 1, 1], [], []>} : vector<80x128xbf16>, vector<128x128xbf16>, vector<80x128xf32> -> vector<80x128xf32>
    %53 = arith.addf %47, %52 : vector<80x128xf32>
    %c20 = arith.constant 20 : index
    %c0_42 = arith.constant 0 : index
    %54 = vector.load %arg9[%c20, %c0_42] : memref<104x128xf32, #tpu.memory_space<vmem>>, vector<80x128xf32>
    %55 = arith.truncf %54 : vector<80x128xf32> to vector<80x128xbf16>
    %c6 = arith.constant 6 : index
    %c0_43 = arith.constant 0 : index
    %c0_44 = arith.constant 0 : index
    %56 = vector.load %arg4[%c6, %c0_43, %c0_44] : memref<9x128x128xbf16, #tpu.memory_space<vmem>>, vector<1x128x128xbf16>
    %57 = vector.shape_cast %56 : vector<1x128x128xbf16> to vector<128x128xbf16>
    %cst_45 = arith.constant dense<0.000000e+00> : vector<80x128xf32>
    %58 = tpu.matmul %55, %57, %cst_45 {dimension_numbers = #tpu.dot_dimension_numbers<[1], [0], [0], [1], [0, 0, 1, 1], [], []>} : vector<80x128xbf16>, vector<128x128xbf16>, vector<80x128xf32> -> vector<80x128xf32>
    %59 = arith.addf %53, %58 : vector<80x128xf32>
    %c21 = arith.constant 21 : index
    %c0_46 = arith.constant 0 : index
    %60 = vector.load %arg9[%c21, %c0_46] : memref<104x128xf32, #tpu.memory_space<vmem>>, vector<80x128xf32>
    %61 = arith.truncf %60 : vector<80x128xf32> to vector<80x128xbf16>
    %c7 = arith.constant 7 : index
    %c0_47 = arith.constant 0 : index
    %c0_48 = arith.constant 0 : index
    %62 = vector.load %arg4[%c7, %c0_47, %c0_48] : memref<9x128x128xbf16, #tpu.memory_space<vmem>>, vector<1x128x128xbf16>
    %63 = vector.shape_cast %62 : vector<1x128x128xbf16> to vector<128x128xbf16>
    %cst_49 = arith.constant dense<0.000000e+00> : vector<80x128xf32>
    %64 = tpu.matmul %61, %63, %cst_49 {dimension_numbers = #tpu.dot_dimension_numbers<[1], [0], [0], [1], [0, 0, 1, 1], [], []>} : vector<80x128xbf16>, vector<128x128xbf16>, vector<80x128xf32> -> vector<80x128xf32>
    %65 = arith.addf %59, %64 : vector<80x128xf32>
    %c22 = arith.constant 22 : index
    %c0_50 = arith.constant 0 : index
    %66 = vector.load %arg9[%c22, %c0_50] : memref<104x128xf32, #tpu.memory_space<vmem>>, vector<80x128xf32>
    %67 = arith.truncf %66 : vector<80x128xf32> to vector<80x128xbf16>
    %c8 = arith.constant 8 : index
    %c0_51 = arith.constant 0 : index
    %c0_52 = arith.constant 0 : index
    %68 = vector.load %arg4[%c8, %c0_51, %c0_52] : memref<9x128x128xbf16, #tpu.memory_space<vmem>>, vector<1x128x128xbf16>
    %69 = vector.shape_cast %68 : vector<1x128x128xbf16> to vector<128x128xbf16>
    %cst_53 = arith.constant dense<0.000000e+00> : vector<80x128xf32>
    %70 = tpu.matmul %67, %69, %cst_53 {dimension_numbers = #tpu.dot_dimension_numbers<[1], [0], [0], [1], [0, 0, 1, 1], [], []>} : vector<80x128xbf16>, vector<128x128xbf16>, vector<80x128xf32> -> vector<80x128xf32>
    %71 = arith.addf %65, %70 : vector<80x128xf32>
    %c0_54 = arith.constant 0 : index
    %c0_55 = arith.constant 0 : index
    %72 = vector.load %arg5[%c0_54, %c0_55] : memref<80x1xf32, #tpu.memory_space<vmem>>, vector<80x1xf32>
    %73 = vector.broadcast %72 : vector<80x1xf32> to vector<80x128xf32>
    %74 = arith.mulf %71, %73 : vector<80x128xf32>
    %75 = arith.truncf %74 : vector<80x128xf32> to vector<80x128xbf16>
    %c0_56 = arith.constant 0 : index
    %c0_57 = arith.constant 0 : index
    %c0_58 = arith.constant 0 : index
    %76 = vector.load %arg6[%c0_56, %c0_57, %c0_58] : memref<1x80x128xbf16, #tpu.memory_space<vmem>>, vector<1x80x128xbf16>
    %77 = vector.shape_cast %76 : vector<1x80x128xbf16> to vector<80x128xbf16>
    %78 = vector.shape_cast %75 : vector<80x128xbf16> to vector<1x80x128xbf16>
    tpu.vector_store %arg6[%c0_56, %c0_57, %c0_58], %78 {strides = array<i32>} : memref<1x80x128xbf16, #tpu.memory_space<vmem>>, vector<1x80x128xbf16>,
    %79 = arith.extf %75 : vector<80x128xbf16> to vector<80x128xf32>
    %cst_59 = arith.constant dense<0.000000e+00> : vector<128xf32>
    %80 = vector.multi_reduction <add>, %79, %cst_59 [0] : vector<80x128xf32> to vector<128xf32>
    %81 = vector.shape_cast %80 : vector<128xf32> to vector<1x128xf32>
    %c0_60 = arith.constant 0 : index
    %c0_61 = arith.constant 0 : index
    %c0_62 = arith.constant 0 : index
    %82 = vector.load %arg7[%c0_60, %c0_61, %c0_62] : memref<1x1x128xf32, #tpu.memory_space<vmem>>, vector<1x1x128xf32>
    %83 = vector.shape_cast %82 : vector<1x1x128xf32> to vector<1x128xf32>
    %84 = vector.shape_cast %81 : vector<1x128xf32> to vector<1x1x128xf32>
    tpu.vector_store %arg7[%c0_60, %c0_61, %c0_62], %84 {strides = array<i32>} : memref<1x1x128xf32, #tpu.memory_space<vmem>>, vector<1x1x128xf32>,
    %85 = arith.mulf %79, %79 : vector<80x128xf32>
    %cst_63 = arith.constant dense<0.000000e+00> : vector<128xf32>
    %86 = vector.multi_reduction <add>, %85, %cst_63 [0] : vector<80x128xf32> to vector<128xf32>
    %87 = vector.shape_cast %86 : vector<128xf32> to vector<1x128xf32>
    %c0_64 = arith.constant 0 : index
    %c0_65 = arith.constant 0 : index
    %c0_66 = arith.constant 0 : index
    %88 = vector.load %arg8[%c0_64, %c0_65, %c0_66] : memref<1x1x128xf32, #tpu.memory_space<vmem>>, vector<1x1x128xf32>
    %89 = vector.shape_cast %88 : vector<1x1x128xf32> to vector<1x128xf32>
    %90 = vector.shape_cast %87 : vector<1x128xf32> to vector<1x1x128xf32>
    tpu.vector_store %arg8[%c0_64, %c0_65, %c0_66], %90 {strides = array<i32>} : memref<1x1x128xf32, #tpu.memory_space<vmem>>, vector<1x1x128xf32>,
    return
  }
  func.func @transform_0(%arg0: i32) -> (i32, i32, i32) {
    %c0_i32 = arith.constant 0 : i32
    %c0_i32_0 = arith.constant 0 : i32
    %c0_i32_1 = arith.constant 0 : i32
    return %arg0, %c0_i32, %c0_i32_0 : i32, i32, i32
  }
  func.func @transform_1(%arg0: i32) -> (i32, i32) {
    %c0_i32 = arith.constant 0 : i32
    %c0_i32_0 = arith.constant 0 : i32
    %c0_i32_1 = arith.constant 0 : i32
    return %c0_i32, %c0_i32_0 : i32, i32
  }
  func.func @transform_2(%arg0: i32) -> (i32, i32) {
    %c0_i32 = arith.constant 0 : i32
    %c0_i32_0 = arith.constant 0 : i32
    %c0_i32_1 = arith.constant 0 : i32
    return %c0_i32, %c0_i32_0 : i32, i32
  }
  func.func @transform_3(%arg0: i32) -> (i32, i32, i32) {
    %c0_i32 = arith.constant 0 : i32
    %c0_i32_0 = arith.constant 0 : i32
    %c0_i32_1 = arith.constant 0 : i32
    %c0_i32_2 = arith.constant 0 : i32
    return %c0_i32, %c0_i32_0, %c0_i32_1 : i32, i32, i32
  }
  func.func @transform_4(%arg0: i32) -> (i32, i32) {
    %c0_i32 = arith.constant 0 : i32
    %c0_i32_0 = arith.constant 0 : i32
    %c0_i32_1 = arith.constant 0 : i32
    return %c0_i32, %c0_i32_0 : i32, i32
  }
  func.func @transform_5(%arg0: i32) -> (i32, i32, i32) {
    %c0_i32 = arith.constant 0 : i32
    %c0_i32_0 = arith.constant 0 : i32
    %c0_i32_1 = arith.constant 0 : i32
    return %arg0, %c0_i32, %c0_i32_0 : i32, i32, i32
  }
  func.func @transform_6(%arg0: i32) -> (i32, i32, i32) {
    %c0_i32 = arith.constant 0 : i32
    %c0_i32_0 = arith.constant 0 : i32
    %c0_i32_1 = arith.constant 0 : i32
    return %arg0, %c0_i32, %c0_i32_0 : i32, i32, i32
  }
  func.func @transform_7(%arg0: i32) -> (i32, i32, i32) {
    %c0_i32 = arith.constant 0 : i32
    %c0_i32_0 = arith.constant 0 : i32
    %c0_i32_1 = arith.constant 0 : i32
    return %arg0, %c0_i32, %c0_i32_0 : i32, i32, i32
  }
}

module attributes {stable_mosaic.version = 11 : i64} {
  func.func @_bn_relu_kernel(%arg0: i32, %arg1: memref<1x80x128xbf16, #tpu.memory_space<vmem>>, %arg2: memref<1x128xf32, #tpu.memory_space<vmem>>, %arg3: memref<1x128xf32, #tpu.memory_space<vmem>>, %arg4: memref<1x80x128xf32, #tpu.memory_space<vmem>>) attributes {dimension_semantics = [#tpu.dimension_semantics<parallel>], iteration_bounds = array<i64: 2>, scalar_prefetch = 0 : i64, scratch_operands = 0 : i64, tpu.core_type = #tpu.core_type<tc>, window_params = [{transform_indices = @transform_0, window_bounds = array<i64: 1, 80, 128>}, {pipeline_mode = #tpu.pipeline_mode<synchronous>, transform_indices = @transform_1, window_bounds = array<i64: 1, 128>}, {pipeline_mode = #tpu.pipeline_mode<synchronous>, transform_indices = @transform_2, window_bounds = array<i64: 1, 128>}, {transform_indices = @transform_3, window_bounds = array<i64: 1, 80, 128>}]} {
    %c0 = arith.constant 0 : index
    %c0_0 = arith.constant 0 : index
    %c0_1 = arith.constant 0 : index
    %0 = vector.load %arg1[%c0, %c0_0, %c0_1] : memref<1x80x128xbf16, #tpu.memory_space<vmem>>, vector<1x80x128xbf16>
    %1 = vector.shape_cast %0 : vector<1x80x128xbf16> to vector<80x128xbf16>
    %2 = arith.extf %1 : vector<80x128xbf16> to vector<80x128xf32>
    %c0_2 = arith.constant 0 : index
    %c0_3 = arith.constant 0 : index
    %3 = vector.load %arg2[%c0_2, %c0_3] : memref<1x128xf32, #tpu.memory_space<vmem>>, vector<1x128xf32>
    %4 = vector.broadcast %3 : vector<1x128xf32> to vector<80x128xf32>
    %5 = arith.mulf %2, %4 : vector<80x128xf32>
    %c0_4 = arith.constant 0 : index
    %c0_5 = arith.constant 0 : index
    %6 = vector.load %arg3[%c0_4, %c0_5] : memref<1x128xf32, #tpu.memory_space<vmem>>, vector<1x128xf32>
    %7 = vector.broadcast %6 : vector<1x128xf32> to vector<80x128xf32>
    %8 = arith.addf %5, %7 : vector<80x128xf32>
    %cst = arith.constant 0.000000e+00 : f32
    %9 = vector.broadcast %cst : f32 to vector<80x128xf32>
    %10 = arith.maximumf %8, %9 : vector<80x128xf32>
    %c0_6 = arith.constant 0 : index
    %c0_7 = arith.constant 0 : index
    %c0_8 = arith.constant 0 : index
    %11 = vector.load %arg4[%c0_6, %c0_7, %c0_8] : memref<1x80x128xf32, #tpu.memory_space<vmem>>, vector<1x80x128xf32>
    %12 = vector.shape_cast %11 : vector<1x80x128xf32> to vector<80x128xf32>
    %13 = vector.shape_cast %10 : vector<80x128xf32> to vector<1x80x128xf32>
    tpu.vector_store %arg4[%c0_6, %c0_7, %c0_8], %13 {strides = array<i32>} : memref<1x80x128xf32, #tpu.memory_space<vmem>>, vector<1x80x128xf32>,
    return
  }
  func.func @transform_0(%arg0: i32) -> (i32, i32, i32) {
    %c0_i32 = arith.constant 0 : i32
    %c0_i32_0 = arith.constant 0 : i32
    %c0_i32_1 = arith.constant 0 : i32
    return %arg0, %c0_i32, %c0_i32_0 : i32, i32, i32
  }
  func.func @transform_1(%arg0: i32) -> (i32, i32) {
    %c0_i32 = arith.constant 0 : i32
    %c0_i32_0 = arith.constant 0 : i32
    %c0_i32_1 = arith.constant 0 : i32
    return %c0_i32, %c0_i32_0 : i32, i32
  }
  func.func @transform_2(%arg0: i32) -> (i32, i32) {
    %c0_i32 = arith.constant 0 : i32
    %c0_i32_0 = arith.constant 0 : i32
    %c0_i32_1 = arith.constant 0 : i32
    return %c0_i32, %c0_i32_0 : i32, i32
  }
  func.func @transform_3(%arg0: i32) -> (i32, i32, i32) {
    %c0_i32 = arith.constant 0 : i32
    %c0_i32_0 = arith.constant 0 : i32
    %c0_i32_1 = arith.constant 0 : i32
    return %arg0, %c0_i32, %c0_i32_0 : i32, i32, i32
  }
}

</mosaic_0001>

<bundles_post_ra>
// kernel: down_forward.5
= control target key start
LH: loop header
LB: loop body
LE: loop exit
PB: predicated region body
PF: predicated region fallthrough
CT: control target
= control target key end

     0   :  { %s367_s12 = smov 0   ;;  %s413_s0 = inlined_call_operand.vmem [shape: bf16[2,80,128], index: 0, kind: input, shape index: {}]   ;;  %s414_s1 = inlined_call_operand.vmem [shape: f32[1,128], index: 1, kind: input, shape index: {}]   ;;  %s415_s2 = inlined_call_operand.vmem [shape: f32[1,128], index: 2, kind: input, shape index: {}]   ;;  %s416_s3 = inlined_call_operand.vmem [shape: f32[2,80,128], index: 3, kind: output, shape index: {}]  }
   0x1 LB: > { %s294_s13 = sadd.s32 4294967295, %s345_s12   ;;  %p298_p0 = scmp.ge.s32.totalorder %s345_s12, 1  ;;  %s345_s12 = sphi %s367_s12, %s13_s12  }
   0x2   : > { %p137_p1 = scmp.lt.s32.totalorder %s345_s12, 3 }
   0x4   : > { %p138_p2 = pnand %p298_p0, %p137_p1 }
   0x5   : > { %p161_p3 = scmp.lt.s32.totalorder (!%p138_p2), %s294_s13, 1 }
   0x6   : > { %141 = sbr.rel (%p138_p2) target bundleno = 34 (0x22), region = 32 }
   0xb   : > { %s418_s13 = smov (!%p161_p3, %s294_s13), 1  ;;  %v337_v0 = vld [vmem:[%s414_s1] ss:$0 sm:$0xff] }
   0xc   : > { %s327_s14 = smul.u32 40, %s418_s13  ;;  %v338_v5 = vld [vmem:[%s415_s2] ss:$0 sm:$0xff] }
   0xd   : > { %s328_s22 = smul.u32 80, %s418_s13 }
   0xe   : > { %s381_s17 = scalar_lea.vmem %s413_s0, %s327_s14 }
   0xf   : > { %v304_v1 = vld [vmem:[%s381_s17] sm:$0xff]   ;;  %v323_v2 = vld [vmem:[%s381_s17 + $0x8] sm:$0xff]   ;;  %v324_v3 = vld [vmem:[%s381_s17 + $0x10] sm:$0xff]   ;;  %s397_s25 = scalar_lea.vmem %s416_s3, %s328_s22 }
  0x10   : > { %v305_v4 = vunpack.c.l.bf16 %v304_v1  ;;  %v306_v6 = vunpack.c.h.bf16 %v304_v1  ;;  %v309_v7 = vunpack.c.l.bf16 %v323_v2  ;;  %v310_v8 = vunpack.c.h.bf16 %v323_v2  ;;  %v325_v9 = vld [vmem:[%s381_s17 + $0x18] sm:$0xff]   ;;  %v326_v28 = vld [vmem:[%s381_s17 + $0x20] sm:$0xff]  }
  0x11   : > { %v313_v10 = vunpack.c.l.bf16 %v324_v3  ;;  %v314_v11 = vunpack.c.h.bf16 %v324_v3  ;;  %v317_v12 = vunpack.c.l.bf16 %v325_v9  ;;  %v318_v13 = vunpack.c.h.bf16 %v325_v9 }
  0x12   : > { %v195_v14 = vmul.f32 %v337_v0, %v305_v4  ;;  %v196_v15 = vmul.f32 %v337_v0, %v306_v6  ;;  %v197_v16 = vmul.f32 %v337_v0, %v309_v7  ;;  %v198_v17 = vmul.f32 %v337_v0, %v310_v8 }
  0x13   : > { %v199_v18 = vmul.f32 %v337_v0, %v313_v10  ;;  %v200_v19 = vmul.f32 %v337_v0, %v314_v11  ;;  %v201_v20 = vmul.f32 %v337_v0, %v317_v12  ;;  %v202_v21 = vmul.f32 %v337_v0, %v318_v13 }
  0x14   : > { %v209_v22 = vadd.f32 %v338_v5, %v195_v14  ;;  %v210_v23 = vadd.f32 %v338_v5, %v196_v15  ;;  %v211_v24 = vadd.f32 %v338_v5, %v197_v16  ;;  %v212_v25 = vadd.f32 %v338_v5, %v198_v17 }
  0x15   : > { %v213_v26 = vadd.f32 %v338_v5, %v199_v18  ;;  %v214_v27 = vadd.f32 %v338_v5, %v200_v19  ;;  %v215_v32 = vadd.f32 %v338_v5, %v201_v20  ;;  %v216_v34 = vadd.f32 %v338_v5, %v202_v21 }
  0x16   : > { %v219_v29 = vmax.f32 %v209_v22, 0.0  ;;  %v220_v30 = vmax.f32 %v210_v23, 0.0  ;;  %v221_v31 = vmax.f32 %v211_v24, 0.0  ;;  %v222_v33 = vmax.f32 %v212_v25, 0.0 }
  0x17   : > { %v223_v35 = vmax.f32 %v213_v26, 0.0  ;;  %v321_v36 = vunpack.c.l.bf16 %v326_v28  ;;  %v322_v37 = vunpack.c.h.bf16 %v326_v28  ;;  %v224_v38 = vmax.f32 %v214_v27, 0.0 }
  0x18   : > { %229 = vst [vmem:[%s397_s25] sm:$0xff] %v219_v29  ;;  %v225_v39 = vmax.f32 %v215_v32, 0.0  ;;  %v226_v42 = vmax.f32 %v216_v34, 0.0 }
  0x19   : > { %230 = vst [vmem:[%s397_s25 + $0x8] sm:$0xff] %v220_v30  ;;  %v203_v40 = vmul.f32 %v337_v0, %v321_v36  ;;  %v204_v41 = vmul.f32 %v337_v0, %v322_v37 }
  0x1a   : > { %231 = vst [vmem:[%s397_s25 + $0x10] sm:$0xff] %v221_v31 }
  0x1b   : > { %232 = vst [vmem:[%s397_s25 + $0x18] sm:$0xff] %v222_v33  ;;  %v217_v43 = vadd.f32 %v338_v5, %v203_v40  ;;  %v218_v44 = vadd.f32 %v338_v5, %v204_v41 }
  0x1c   : > { %233 = vst [vmem:[%s397_s25 + $0x20] sm:$0xff] %v223_v35 }
  0x1d   : > { %234 = vst [vmem:[%s397_s25 + $0x28] sm:$0xff] %v224_v38  ;;  %v227_v45 = vmax.f32 %v217_v43, 0.0  ;;  %v228_v46 = vmax.f32 %v218_v44, 0.0 }
  0x1e   : > { %235 = vst [vmem:[%s397_s25 + $0x30] sm:$0xff] %v225_v39 }
  0x1f   : > { %236 = vst [vmem:[%s397_s25 + $0x38] sm:$0xff] %v226_v42 }
  0x20   : > { %237 = vst [vmem:[%s397_s25 + $0x40] sm:$0xff] %v227_v45 }
  0x21   : > { %238 = vst [vmem:[%s397_s25 + $0x48] sm:$0xff] %v228_v46 }
  0x22 PF: > { %s13_s12 = sadd.s32 1, %s345_s12  }
  0x23   : > { %p10_p4 = scmp.ge.s32.totalorder %s13_s12, 4  }
  0x25   :  { %12 = sbr.rel (!%p10_p4) target bundleno = 1 (0x1), region = 62 }

// kernel: down_forward.3
= control target key start
LH: loop header
LB: loop body
LE: loop exit
PB: predicated region body
PF: predicated region fallthrough
CT: control target
= control target key end

     0   :  { %s1471_s18 = smov 0   ;;  %s1722_s0 = inlined_call_operand.vmem [shape: f32[2,16,16,4], index: 0, kind: input, shape index: {}]   ;;  %s1723_s1 = inlined_call_operand.vmem [shape: bf16[9,4,128], index: 1, kind: input, shape index: {}]   ;;  %s1724_s2 = inlined_call_operand.vmem [shape: f32[80,1], index: 2, kind: input, shape index: {}]   ;;  %s1725_s3 = inlined_call_operand.vmem [shape: bf16[2,80,128], index: 3, kind: output, shape index: {0}]   ;;  %s1726_s4 = inlined_call_operand.vmem [shape: f32[2,1,128], index: 4, kind: output, shape index: {1}]   ;;  %s1727_s5 = inlined_call_operand.vmem [shape: f32[2,1,128], index: 5, kind: output, shape index: {2}]  }
   0x1 LB: > { %s1290_s19 = sadd.s32 4294967295, %s1437_s18   ;;  %p1294_p0 = scmp.ge.s32.totalorder %s1437_s18, 1  ;;  %s1437_s18 = sphi %s1471_s18, %s16_s18  }
   0x2   : > { %p192_p1 = scmp.lt.s32.totalorder %s1437_s18, 3 }
   0x4   : > { %p193_p2 = pnand %p1294_p0, %p192_p1 }
   0x5   : > { %p226_p3 = scmp.lt.s32.totalorder (!%p193_p2), %s1290_s19, 1 }
   0x6   : > { %196 = sbr.rel (%p193_p2) target bundleno = 386 (0x182), region = 32 }
   0xb   : > { %v1329_v0 = vld [vmem:[%s1723_s1 + $0x2] sm:$0x3]  ;;  %vm400_vm0 = vcmask 1041408   ;;  %vm330_vm1 = vcmask 31744   ;;  %v1439_v2 = vmov 0.0   ;;  %s1729_s19 = smov (!%p226_p3, %s1290_s19), 1 }
   0xc   : > { %v402_v1 = vsel %vm400_vm0, %v1329_v0, 0  ;;  %332 = vst.msk [vmem:[#allocation2 + $0x8] sm:$0xff] %vm330_vm1, %v1439_v2  ;;  %v1340_v3 = vld [vmem:[%s1723_s1 + $0x4] sm:$0x3]  ;;  %v367_v4 = vld [vmem:[%s1723_s1] sm:$0x3]  ;;  %s238_s22 = scalar_lea.vmem %s1726_s4, %s1729_s19  ;;  %s241_s25 = scalar_lea.vmem %s1727_s5, %s1729_s19 }
   0xd   : > { %1414 = vmatpush.bf16.msra.mxu1 %v402_v1  ;;  %1415 = vmatpush.bf16.msra.mxu2 %v402_v1  ;;  %333 = vst.msk [vmem:[#allocation2 + $0x10] sm:$0xff] %vm330_vm1, %v1439_v2  ;;  %v523_v5 = vsel %vm400_vm0, %v1340_v3, 0  ;;  %v454_v6 = vsel %vm400_vm0, %v367_v4, 0  ;;  %s1384_s26 = sshll.u32 %s1729_s19, 8  ;;  %v1346_v55 = vld [vmem:[%s1723_s1 + $0x6] sm:$0x3] }
   0xe   : > { %334 = vst.msk [vmem:[#allocation2 + $0x18] sm:$0xff] %vm330_vm1, %v1439_v2  ;;  %1416 = vmatpush.bf16.msra.mxu3 %v402_v1  ;;  %411 = vmatpush.bf16.msra.mxu0 %v402_v1  ;;  %s1505_s29 = scalar_lea.vmem %s1722_s0, %s1384_s26  ;;  %v1352_v56 = vld [vmem:[%s1723_s1 + $0x8] sm:$0x3]  ;;  %v602_v58 = vsel %vm400_vm0, %v1346_v55, 0  ;;  %s1417_s14 = smul.u32 40, %s1729_s19 }
   0xf   : > { %335 = vst.msk [vmem:[#allocation2 + $0x20] sm:$0xff] %vm330_vm1, %v1439_v2  ;;  %v243_v7 = vld [vmem:[%s1505_s29] ss:$2 sm:$0xff]  ;;  %v1298_v8 = vld [vmem:[%s1505_s29 + $0x10] ss:$2 sm:$0xff]  ;;  %v681_v59 = vsel %vm400_vm0, %v1352_v56, 0 }
  0x10   : > { %331 = vst.msk [vmem:[#allocation2] sm:$0xff] %vm330_vm1, %v1439_v2  ;;  %v1299_v9 = vld [vmem:[%s1505_s29 + $0x20] ss:$2 sm:$0xff]  ;;  %v1300_v10 = vld [vmem:[%s1505_s29 + $0x30] ss:$2 sm:$0xff]  ;;  %s1697_s17 = scalar_lea.vmem %s1725_s3, %s1417_s14 }
  0x11   : > { %532 = vmatpush.bf16.msrb.mxu2 %v523_v5  ;;  %463 = vmatpush.bf16.msrb.mxu1 %v454_v6  ;;  %v1301_v11 = vld [vmem:[%s1505_s29 + $0x40] ss:$2 sm:$0xff]  ;;  %v1302_v12 = vld [vmem:[%s1505_s29 + $0x50] ss:$2 sm:$0xff]  ;;  %v1313_v13 = vld [vmem:[%s1505_s29 + $0x1] ss:$2 sm:$0xff] }
  0x12   : > { %v1314_v14 = vld [vmem:[%s1505_s29 + $0x11] ss:$2 sm:$0xff]  ;;  %v1315_v15 = vld [vmem:[%s1505_s29 + $0x21] ss:$2 sm:$0xff]  ;;  %v306_v19 = vmax.f32 %v243_v7, %v1313_v13  ;;  %336 = vst.msk [vmem:[#allocation2 + $0x28] sm:$0xff] %vm330_vm1, %v1439_v2  ;;  %611 = vmatpush.bf16.msrb.mxu3 %v602_v58  ;;  %690 = vmatpush.bf16.msrb.mxu0 %v681_v59 }
  0x13   : > { %v1316_v16 = vld [vmem:[%s1505_s29 + $0x31] ss:$2 sm:$0xff]  ;;  %v1317_v17 = vld [vmem:[%s1505_s29 + $0x41] ss:$2 sm:$0xff]  ;;  %v307_v20 = vmax.f32 %v1298_v8, %v1314_v14  ;;  %v308_v21 = vmax.f32 %v1299_v9, %v1315_v15  ;;  %v1303_v25 = vld [vmem:[%s1505_s29 + $0x60] ss:$2 sm:$0xff] }
  0x14   : > { %v1318_v18 = vld [vmem:[%s1505_s29 + $0x51] ss:$2 sm:$0xff]  ;;  %v309_v22 = vmax.f32 %v1300_v10, %v1316_v16  ;;  %v310_v23 = vmax.f32 %v1301_v11, %v1317_v17  ;;  %v1304_v26 = vld [vmem:[%s1505_s29 + $0x70] ss:$2 sm:$0xff]  ;;  %337 = vst.msk [vmem:[#allocation2 + $0x30] sm:$0xff] %vm330_vm1, %v1439_v2 }
  0x15   : > { %v311_v24 = vmax.f32 %v1302_v12, %v1318_v18  ;;  %v322_v27 = vmax.f32 %v306_v19, %v307_v20  ;;  %v1319_v28 = vld [vmem:[%s1505_s29 + $0x61] ss:$2 sm:$0xff]  ;;  %v1320_v29 = vld [vmem:[%s1505_s29 + $0x71] ss:$2 sm:$0xff]  ;;  %338 = vst.msk [vmem:[#allocation2 + $0x38] sm:$0xff] %vm330_vm1, %v1439_v2 }
  0x16   : > { %v323_v30 = vmax.f32 %v308_v21, %v309_v22  ;;  %v1307_v32 = vld [vmem:[%s1505_s29 + $0xa0] ss:$2 sm:$0xff]  ;;  %v1308_v33 = vld [vmem:[%s1505_s29 + $0xb0] ss:$2 sm:$0xff]  ;;  %v312_v34 = vmax.f32 %v1303_v25, %v1319_v28  ;;  %v313_v35 = vmax.f32 %v1304_v26, %v1320_v29  ;;  %v1323_v38 = vld [vmem:[%s1505_s29 + $0xa1] ss:$2 sm:$0xff] }
  0x17   : > { %v324_v31 = vmax.f32 %v310_v23, %v311_v24  ;;  %344 = vst.msk [vmem:[#allocation2 + $0xb] sm:$0xff] %vm330_vm1, %v322_v27  ;;  %v1309_v36 = vld [vmem:[%s1505_s29 + $0xc0] ss:$2 sm:$0xff]  ;;  %v1310_v37 = vld [vmem:[%s1505_s29 + $0xd0] ss:$2 sm:$0xff]  ;;  %v316_v42 = vmax.f32 %v1307_v32, %v1323_v38 }
  0x18   : > { %345 = vst.msk [vmem:[#allocation2 + $0x15] sm:$0xff] %vm330_vm1, %v323_v30  ;;  %v1324_v39 = vld [vmem:[%s1505_s29 + $0xb1] ss:$2 sm:$0xff]  ;;  %v1325_v40 = vld [vmem:[%s1505_s29 + $0xc1] ss:$2 sm:$0xff]  ;;  %v325_v48 = vmax.f32 %v312_v34, %v313_v35 }
  0x19   : > { %346 = vst.msk [vmem:[#allocation2 + $0x1f] sm:$0xff] %vm330_vm1, %v324_v31  ;;  %v1326_v41 = vld [vmem:[%s1505_s29 + $0xd1] ss:$2 sm:$0xff]  ;;  %v317_v43 = vmax.f32 %v1308_v33, %v1324_v39  ;;  %v318_v44 = vmax.f32 %v1309_v36, %v1325_v40  ;;  %v1305_v46 = vld [vmem:[%s1505_s29 + $0x80] ss:$2 sm:$0xff] }
  0x1a   : > { %339 = vst.msk [vmem:[#allocation2 + $0x40] sm:$0xff] %vm330_vm1, %v1439_v2  ;;  %v319_v45 = vmax.f32 %v1310_v37, %v1326_v41  ;;  %v1306_v47 = vld [vmem:[%s1505_s29 + $0x90] ss:$2 sm:$0xff]  ;;  %v1321_v49 = vld [vmem:[%s1505_s29 + $0x81] ss:$2 sm:$0xff] }
  0x1b   : > { %340 = vst.msk [vmem:[#allocation2 + $0x48] sm:$0xff] %vm330_vm1, %v1439_v2  ;;  %v1322_v50 = vld [vmem:[%s1505_s29 + $0x91] ss:$2 sm:$0xff]  ;;  %v327_v51 = vmax.f32 %v316_v42, %v317_v43  ;;  %v314_v52 = vmax.f32 %v1305_v46, %v1321_v49  ;;  %v368_v54 = vld [vmem:[#allocation2 + $0x1] sm:$0xff]  ;;  %v1364_v8 = vld [vmem:[%s1723_s1 + $0xc] sm:$0x3] }
  0x1c   : > { %341 = vst.msk [vmem:[#allocation2 + $0x50] sm:$0xff] %vm330_vm1, %v1439_v2  ;;  %v315_v53 = vmax.f32 %v1306_v47, %v1322_v50  ;;  %v328_v57 = vmax.f32 %v318_v44, %v319_v45  ;;  %v839_v10 = vsel %vm400_vm0, %v1364_v8, 0  ;;  %v1370_v12 = vld [vmem:[%s1723_s1 + $0xe] sm:$0x3]  ;;  %v1358_v13 = vld [vmem:[%s1723_s1 + $0xa] sm:$0x3] }
  0x1d   : > { %342 = vst.msk [vmem:[#allocation2 + $0x58] sm:$0xff] %vm330_vm1, %v1439_v2  ;;  %v918_v14 = vsel %vm400_vm0, %v1370_v12, 0  ;;  %v760_v15 = vsel %vm400_vm0, %v1358_v13, 0  ;;  %v1376_v16 = vld [vmem:[%s1723_s1 + $0x10] sm:$0x3]  ;;  %v352_v17 = vld [vmem:[#allocation2] sm:$0xff] }
  0x1e   : > { %343 = vst.msk [vmem:[#allocation2 + $0x60] sm:$0xff] %vm330_vm1, %v1439_v2  ;;  %v326_v60 = vmax.f32 %v314_v52, %v315_v53  ;;  %v369_v61 = vld [vmem:[#allocation2 + $0x9] sm:$0xff]  ;;  %v997_v19 = vsel %vm400_vm0, %v1376_v16, 0 }
  0x1f   : > { %v370_v62 = vld [vmem:[#allocation2 + $0x11] sm:$0xff]  ;;  %347 = vst.msk [vmem:[#allocation2 + $0x29] sm:$0xff] %vm330_vm1, %v325_v48  ;;  %v378_v63 = vpack.c.bf16 %v369_v61, %v368_v54  ;;  %v353_v18 = vld [vmem:[#allocation2 + $0x8] sm:$0xff] }
  0x20   : > { %v371_v0 = vld [vmem:[#allocation2 + $0x19] sm:$0xff]  ;;  %349 = vst.msk [vmem:[#allocation2 + $0x3d] sm:$0xff] %vm330_vm1, %v327_v51  ;;  %v372_v2 = vld [vmem:[#allocation2 + $0x21] sm:$0xff]  ;;  %v648_v9 = vld [vmem:[#allocation2 + $0xb] sm:$0xff]  ;;  %v362_v21 = vpack.c.bf16 %v353_v18, %v352_v17 }
  0x21   : > { %v379_v1 = vpack.c.bf16 %v371_v0, %v370_v62  ;;  %350 = vst.msk [vmem:[#allocation2 + $0x47] sm:$0xff] %vm330_vm1, %v328_v57  ;;  %1330 = vmatmul.msk.bf16.vlgmr.msra.gmra.mxu0 %vm330_vm1, %v378_v63  ;;  %v649_v11 = vld [vmem:[#allocation2 + $0x13] sm:$0xff]  ;;  %v569_v24 = vld [vmem:[#allocation2 + $0xa] sm:$0xff]  ;;  %v650_v28 = vld [vmem:[#allocation2 + $0x1b] sm:$0xff] }
  0x22   : > { %348 = vst.msk [vmem:[#allocation2 + $0x33] sm:$0xff] %vm330_vm1, %v326_v60  ;;  %v658_v20 = vpack.c.bf16 %v649_v11, %v648_v9  ;;  %1006 = vmatpush.bf16.msra.mxu0 %v997_v19  ;;  %v570_v25 = vld [vmem:[#allocation2 + $0x12] sm:$0xff]  ;;  %v490_v34 = vld [vmem:[#allocation2 + $0x2] sm:$0xff]  ;;  %v571_v35 = vld [vmem:[#allocation2 + $0x1a] sm:$0xff] }
  0x23   : > { %1331 = vmatmul.msk.bf16.vlgmr.msra.gmra.mxu1 %vm330_vm1, %v379_v1  ;;  %v579_v27 = vpack.c.bf16 %v570_v25, %v569_v24  ;;  %v354_v30 = vld [vmem:[#allocation2 + $0x10] sm:$0xff]  ;;  %v355_v31 = vld [vmem:[#allocation2 + $0x18] sm:$0xff]  ;;  %v500_v37 = vpack.c.bf16 %v569_v24, %v490_v34  ;;  %v356_v41 = vld [vmem:[#allocation2 + $0x20] sm:$0xff]  ;;  %v501_v50 = vpack.c.bf16 %v571_v35, %v570_v25 }
  0x24   : > { %769 = vmatpush.bf16.msra.mxu1 %v760_v15  ;;  %v363_v33 = vpack.c.bf16 %v355_v31, %v354_v30  ;;  %v1311_v47 = vld [vmem:[%s1505_s29 + $0xe0] ss:$2 sm:$0xff]  ;;  %v1312_v48 = vld [vmem:[%s1505_s29 + $0xf0] ss:$2 sm:$0xff]  ;;  %v1327_v49 = vld [vmem:[%s1505_s29 + $0xe1] ss:$2 sm:$0xff] }
  0x25   : > { %v1328_v51 = vld [vmem:[%s1505_s29 + $0xf1] ss:$2 sm:$0xff]  ;;  %v320_v52 = vmax.f32 %v1311_v47, %v1327_v49 }
  0x26   : > { %v373_v3 = vld [vmem:[#allocation2 + $0x29] sm:$0xff]  ;;  %v321_v53 = vmax.f32 %v1312_v48, %v1328_v51  ;;  %v964_v12 = vld [vmem:[#allocation2 + $0x16] sm:$0xff]  ;;  %v965_v13 = vld [vmem:[#allocation2 + $0x1e] sm:$0xff] }
  0x27   : > { %v380_v4 = vpack.c.bf16 %v373_v3, %v372_v2  ;;  %v651_v29 = vld [vmem:[#allocation2 + $0x23] sm:$0xff]  ;;  %v652_v39 = vld [vmem:[#allocation2 + $0x2b] sm:$0xff]  ;;  %v654_v56 = vld [vmem:[#allocation2 + $0x3b] sm:$0xff]  ;;  %v974_v16 = vpack.c.bf16 %v965_v13, %v964_v12 }
  0x28   : > { %v376_v5 = vld [vmem:[#allocation2 + $0x41] sm:$0xff]  ;;  %v377_v6 = vld [vmem:[#allocation2 + $0x49] sm:$0xff]  ;;  %v659_v32 = vpack.c.bf16 %v651_v29, %v650_v28  ;;  %v329_v55 = vmax.f32 %v320_v52, %v321_v53  ;;  %v728_v15 = vld [vmem:[#allocation2 + $0x14] sm:$0xff]  ;;  %v1440_v28 = vmov 0  }
  0x29   : > { %1332 = vmatmul.msk.bf16.vlgmr.msra.gmra.mxu2 %vm330_vm1, %v380_v4  ;;  %v382_v7 = vpack.c.bf16 %v377_v6, %v376_v5  ;;  %v374_v22 = vld [vmem:[#allocation2 + $0x31] sm:$0xff]  ;;  %v375_v23 = vld [vmem:[#allocation2 + $0x39] sm:$0xff]  ;;  %v572_v36 = vld [vmem:[#allocation2 + $0x22] sm:$0xff]  ;;  %1428 = vset.pattern.permute.xlu0 %v1440_v28 }
  0x2a   : > { %848 = vmatpush.bf16.msra.mxu2 %v839_v10  ;;  %v381_v26 = vpack.c.bf16 %v375_v23, %v374_v22  ;;  %v580_v38 = vpack.c.bf16 %v572_v36, %v571_v35  ;;  %v653_v40 = vld [vmem:[#allocation2 + $0x33] sm:$0xff]  ;;  %v357_v42 = vld [vmem:[#allocation2 + $0x28] sm:$0xff]  ;;  %351 = vst.msk [vmem:[#allocation2 + $0x51] sm:$0xff] %vm330_vm1, %v329_v55  ;;  %v360_v4 = vld [vmem:[#allocation2 + $0x40] sm:$0xff]  ;;  %1429 = vset.pattern.permute.xlu1 %v1440_v28 }
  0x2b   : > { %1334 = vmatmul.msk.bf16.vlgmr.msra.gmra.mxu3 %vm330_vm1, %v382_v7  ;;  %v660_v43 = vpack.c.bf16 %v653_v40, %v652_v39  ;;  %v364_v44 = vpack.c.bf16 %v357_v42, %v356_v41  ;;  %v573_v45 = vld [vmem:[#allocation2 + $0x2a] sm:$0xff]  ;;  %v574_v46 = vld [vmem:[#allocation2 + $0x32] sm:$0xff]  ;;  %v575_v62 = vld [vmem:[#allocation2 + $0x3a] sm:$0xff]  ;;  %1430 = vset.pattern.permute.xlu2 %v1440_v28 }
  0x2c   : > { %927 = vmatpush.bf16.msra.mxu3 %v918_v14  ;;  %v581_v54 = vpack.c.bf16 %v574_v46, %v573_v45  ;;  %v655_v57 = vld [vmem:[#allocation2 + $0x43] sm:$0xff]  ;;  %v358_v58 = vld [vmem:[#allocation2 + $0x30] sm:$0xff]  ;;  %v359_v59 = vld [vmem:[#allocation2 + $0x38] sm:$0xff]  ;;  %v502_v0 = vpack.c.bf16 %v573_v45, %v572_v36  ;;  %v503_v10 = vpack.c.bf16 %v575_v62, %v574_v46 }
  0x2d   : > { %v661_v60 = vpack.c.bf16 %v655_v57, %v654_v56  ;;  %v365_v61 = vpack.c.bf16 %v359_v59, %v358_v58  ;;  %v576_v63 = vld [vmem:[#allocation2 + $0x42] sm:$0xff]  ;;  %v727_v14 = vld [vmem:[#allocation2 + $0xc] sm:$0xff]  ;;  %v885_v18 = vld [vmem:[#allocation2 + $0x15] sm:$0xff] }
  0x2e   : > { %v582_v1 = vpack.c.bf16 %v576_v63, %v575_v62  ;;  %v361_v5 = vld [vmem:[#allocation2 + $0x48] sm:$0xff]  ;;  %v737_v17 = vpack.c.bf16 %v728_v15, %v727_v14  ;;  %v886_v19 = vld [vmem:[#allocation2 + $0x1d] sm:$0xff]  ;;  %v1045_v39 = vld [vmem:[%s1724_s2 + $0x10] sm:$0xff] }
  0x2f   : > { %v366_v7 = vpack.c.bf16 %v361_v5, %v360_v4  ;;  %v966_v22 = vld [vmem:[#allocation2 + $0x26] sm:$0xff]  ;;  %v967_v23 = vld [vmem:[#allocation2 + $0x2e] sm:$0xff]  ;;  %v729_v24 = vld [vmem:[#allocation2 + $0x1c] sm:$0xff]  ;;  %1065 = vperm.xlu1 %1429, %v1045_v39  }
  0x30   : > { %v730_v25 = vld [vmem:[#allocation2 + $0x24] sm:$0xff]  ;;  %v888_v31 = vld [vmem:[#allocation2 + $0x2d] sm:$0xff]  ;;  %v968_v35 = vld [vmem:[#allocation2 + $0x36] sm:$0xff] }
  0x31   : > { %1353 = vmatmul.msk.bf16.vlgmr.msrb.gmra.mxu0 %vm330_vm1, %v658_v20  ;;  %v656_v2 = vld [vmem:[#allocation2 + $0x4b] sm:$0xff]  ;;  %v657_v3 = vld [vmem:[#allocation2 + $0x53] sm:$0xff]  ;;  %v738_v29 = vpack.c.bf16 %v730_v25, %v729_v24  ;;  %v969_v36 = vld [vmem:[#allocation2 + $0x3e] sm:$0xff] }
  0x32   : > { %v662_v6 = vpack.c.bf16 %v657_v3, %v656_v2  ;;  %v577_v8 = vld [vmem:[#allocation2 + $0x4a] sm:$0xff]  ;;  %v578_v9 = vld [vmem:[#allocation2 + $0x52] sm:$0xff]  ;;  %v976_v40 = vpack.c.bf16 %v969_v36, %v968_v35  ;;  %v890_v45 = vld [vmem:[#allocation2 + $0x3d] sm:$0xff] }
  0x33   : > { %1335 = vmatmul.msk.bf16.vlgmr.msrb.gmra.mxu1 %vm330_vm1, %v362_v21  ;;  %v583_v11 = vpack.c.bf16 %v578_v9, %v577_v8  ;;  %v504_v20 = vpack.c.bf16 %v577_v8, %v576_v63  ;;  %v895_v21 = vpack.c.bf16 %v886_v19, %v885_v18  ;;  %v887_v30 = vld [vmem:[#allocation2 + $0x25] sm:$0xff]  ;;  %v1046_v46 = vld [vmem:[%s1724_s2 + $0x18] sm:$0xff]  ;;  %v971_v52 = vld [vmem:[#allocation2 + $0x4e] sm:$0xff] }
  0x34   : > { %v896_v34 = vpack.c.bf16 %v888_v31, %v887_v30  ;;  %v970_v51 = vld [vmem:[#allocation2 + $0x46] sm:$0xff]  ;;  %v1049_v5 = vld [vmem:[%s1724_s2 + $0x30] sm:$0xff]  ;;  %v973_v9 = vld [vmem:[#allocation2 + $0x5e] sm:$0xff] }
  0x35   : > { %v734_v55 = vld [vmem:[#allocation2 + $0x44] sm:$0xff]  ;;  %v977_v56 = vpack.c.bf16 %v971_v52, %v970_v51  ;;  %v972_v8 = vld [vmem:[#allocation2 + $0x56] sm:$0xff] }
  0x36   : > { %v891_v63 = vld [vmem:[#allocation2 + $0x45] sm:$0xff]  ;;  %v736_v12 = vld [vmem:[#allocation2 + $0x54] sm:$0xff]  ;;  %v978_v13 = vpack.c.bf16 %v973_v9, %v972_v8  ;;  %v815_v39 = vld [vmem:[#allocation2 + $0x5c] sm:$0xff] }
  0x37   : > { %1070 = vperm.xlu1 %1429, %v1046_v46   ;;  %v1050_v18 = vld [vmem:[%s1724_s2 + $0x38] sm:$0xff]  ;;  %v1048_v35 = vld [vmem:[%s1724_s2 + $0x28] sm:$0xff]  ;;  %v1051_v52 = vld [vmem:[%s1724_s2 + $0x40] sm:$0xff] }
  0x39   : > { %1333 = vmatmul.msk.bf16.gmra.mxu2 %vm330_vm1, %v381_v26  ;;  %v1043_v26 = vld [vmem:[%s1724_s2] sm:$0xff] }
  0x3a   : > { %1055 = vperm.xlu0 %1428, %v1043_v26  }
  0x3b   : > { %1347 = vmatmul.msk.bf16.vlgmr.msrb.gmra.mxu3 %vm330_vm1, %v579_v27  ;;  %v975_v27 = vpack.c.bf16 %v967_v23, %v966_v22  ;;  %v893_v22 = vld [vmem:[#allocation2 + $0x55] sm:$0xff]  ;;  %v894_v23 = vld [vmem:[#allocation2 + $0x5d] sm:$0xff] }
  0x3c   : > { %v899_v26 = vpack.c.bf16 %v894_v23, %v893_v22 }
  0x3f   : > { %1090 = vperm.xlu1 %1429, %v1050_v18  }
  0x41   : > { %1354 = vmatmul.msk.bf16.gmra.mxu0 %vm330_vm1, %v659_v32  ;;  %v1044_v32 = vld [vmem:[%s1724_s2 + $0x8] sm:$0xff] }
  0x42   : > { %1060 = vperm.xlu0 %1428, %v1044_v32  }
  0x43   : > { %1336 = vmatmul.msk.bf16.gmra.mxu1 %vm330_vm1, %v363_v33  ;;  %v816_v33 = vpack.c.bf16 %v729_v24, %v728_v15 }
  0x49   : > { %1341 = vmatmul.msk.bf16.vlgmr.msrb.gmra.mxu2 %vm330_vm1, %v500_v37  ;;  %v731_v37 = vld [vmem:[#allocation2 + $0x2c] sm:$0xff] }
  0x4a   : > { %v817_v47 = vpack.c.bf16 %v731_v37, %v730_v25  ;;  %1085 = vperm.xlu0 %1428, %v1049_v5  }
  0x4b   : > { %1348 = vmatmul.msk.bf16.gmra.mxu3 %vm330_vm1, %v580_v38  ;;  %v732_v38 = vld [vmem:[#allocation2 + $0x34] sm:$0xff] }
  0x4c   : > { %v739_v42 = vpack.c.bf16 %v732_v38, %v731_v37 }
  0x51   : > { %1355 = vmatmul.msk.bf16.gmra.mxu0 %vm330_vm1, %v660_v43 }
  0x53   : > { %1337 = vmatmul.msk.bf16.gmra.mxu1 %vm330_vm1, %v364_v44  ;;  %v889_v44 = vld [vmem:[#allocation2 + $0x35] sm:$0xff] }
  0x54   : > { %v897_v49 = vpack.c.bf16 %v890_v45, %v889_v44 }
  0x59   : > { %1342 = vmatmul.msk.bf16.gmra.mxu2 %vm330_vm1, %v501_v50 }
  0x5b   : > { %1349 = vmatmul.msk.bf16.gmra.mxu3 %vm330_vm1, %v581_v54  ;;  %v733_v54 = vld [vmem:[#allocation2 + $0x3c] sm:$0xff] }
  0x5c   : > { %v740_v59 = vpack.c.bf16 %v734_v55, %v733_v54 }
  0x61   : > { %1356 = vmatmul.msk.bf16.gmra.mxu0 %vm330_vm1, %v661_v60 }
  0x63   : > { %1338 = vmatmul.msk.bf16.gmra.mxu1 %vm330_vm1, %v365_v61 }
  0x69   : > { %1343 = vmatmul.msk.bf16.gmra.mxu2 %vm330_vm1, %v502_v0  ;;  %v892_v0 = vld [vmem:[#allocation2 + $0x4d] sm:$0xff] }
  0x6a   : > { %v898_v4 = vpack.c.bf16 %v892_v0, %v891_v63 }
  0x6b   : > { %1350 = vmatmul.msk.bf16.gmra.mxu3 %vm330_vm1, %v582_v1  ;;  %v818_v1 = vpack.c.bf16 %v733_v54, %v732_v38 }
  0x71   : > { %1357 = vmatmul.msk.bf16.gmra.mxu0 %vm330_vm1, %v662_v6 }
  0x73   : > { %1339 = vmatmul.msk.bf16.gmra.mxu1 %vm330_vm1, %v366_v7 }
  0x79   : > { %1344 = vmatmul.msk.bf16.gmra.mxu2 %vm330_vm1, %v503_v10 }
  0x7b   : > { %1351 = vmatmul.msk.bf16.gmra.mxu3 %vm330_vm1, %v583_v11  ;;  %v735_v11 = vld [vmem:[#allocation2 + $0x4c] sm:$0xff] }
  0x7c   : > { %v819_v24 = vpack.c.bf16 %v735_v11, %v734_v55 }
  0x81   : > { %1377 = vmatmul.msk.bf16.vlgmr.msra.gmra.mxu0 %vm330_vm1, %v974_v16  ;;  %v741_v16 = vpack.c.bf16 %v736_v12, %v735_v11 }
  0x83   : > { %1359 = vmatmul.msk.bf16.vlgmr.msra.gmra.mxu1 %vm330_vm1, %v737_v17  ;;  %v1052_v17 = vld [vmem:[%s1724_s2 + $0x48] sm:$0xff] }
  0x84   : > { %1100 = vperm.xlu0 %1428, %v1052_v17  }
  0x89   : > { %1345 = vmatmul.msk.bf16.gmra.mxu2 %vm330_vm1, %v504_v20 }
  0x8b   : > { %1371 = vmatmul.msk.bf16.vlgmr.msra.gmra.mxu3 %vm330_vm1, %v895_v21 }
  0x91   : > { %1378 = vmatmul.msk.bf16.gmra.mxu0 %vm330_vm1, %v975_v27  ;;  %v1047_v27 = vld [vmem:[%s1724_s2 + $0x20] sm:$0xff] }
  0x92   : > { %1075 = vperm.xlu2 %1430, %v1047_v27  }
  0x93   : > { %1360 = vmatmul.msk.bf16.gmra.mxu1 %vm330_vm1, %v738_v29 }
  0x99   : > { %1365 = vmatmul.msk.bf16.vlgmr.msra.gmra.mxu2 %vm330_vm1, %v816_v33 }
  0x9a   : > { %1080 = vperm.xlu2 %1430, %v1048_v35  }
  0x9b   : > { %1372 = vmatmul.msk.bf16.gmra.mxu3 %vm330_vm1, %v896_v34 }
  0x9e   : > { %v413_v41 = vpop.f32.mrf.mxu0 }
  0xa0   : > { %v418_v43 = vpop.f32.mrf.mxu1 }
  0xa1   : > { %1379 = vmatmul.msk.bf16.gmra.mxu0 %vm330_vm1, %v976_v40 }
  0xa2   : > { %1095 = vperm.xlu2 %1430, %v1051_v52  }
  0xa3   : > { %1361 = vmatmul.msk.bf16.gmra.mxu1 %vm330_vm1, %v739_v42 }
  0xa6   : > { %v415_v48 = vpop.f32.mrf.mxu0 }
  0xa8   : > { %v420_v50 = vpop.f32.mrf.mxu1 }
  0xa9   : > { %1366 = vmatmul.msk.bf16.gmra.mxu2 %vm330_vm1, %v817_v47 }
  0xab   : > { %1373 = vmatmul.msk.bf16.gmra.mxu3 %vm330_vm1, %v897_v49 }
  0xac   : > { %v423_v53 = vpop.f32.mrf.mxu2 }
  0xae   : > { %v1637_v57 = vpop.f32.mrf.mxu3  ;;  %v692_v58 = vpop.f32.mrf.mxu0 }
  0xb0   : > { %v465_v60 = vpop.f32.mrf.mxu1 }
  0xb1   : > { %v466_v61 = vadd.f32 %v465_v60, %v413_v41  ;;  %1380 = vmatmul.msk.bf16.gmra.mxu0 %vm330_vm1, %v977_v56 }
  0xb3   : > { %1362 = vmatmul.msk.bf16.gmra.mxu1 %vm330_vm1, %v740_v59 }
  0xb4   : > { %v425_v62 = vpop.f32.mrf.mxu2 }
  0xb6   : > { %v1641_v2 = vpop.f32.mrf.mxu3  ;;  %v694_v3 = vpop.f32.mrf.mxu0 }
  0xb8   : > { %v467_v6 = vpop.f32.mrf.mxu1 }
  0xb9   : > { %1367 = vmatmul.msk.bf16.gmra.mxu2 %vm330_vm1, %v818_v1  ;;  %v468_v7 = vadd.f32 %v467_v6, %v415_v48 }
  0xbb   : > { %1374 = vmatmul.msk.bf16.gmra.mxu3 %vm330_vm1, %v898_v4 }
  0xbc   : > { %v428_v10 = vpop.f32.mrf.mxu2 }
  0xbe   : > { %v613_v14 = vpop.f32.mrf.mxu3  ;;  %v697_v15 = vpop.f32.mrf.mxu0 }
  0xc0   : > { %v470_v19 = vpop.f32.mrf.mxu1 }
  0xc1   : > { %v471_v20 = vadd.f32 %v470_v19, %v418_v43  ;;  %1381 = vmatmul.msk.bf16.gmra.mxu0 %vm330_vm1, %v978_v13  ;;  %v820_v43 = vpack.c.bf16 %v815_v39, %v736_v12 }
  0xc3   : > { %1363 = vmatmul.msk.bf16.gmra.mxu1 %vm330_vm1, %v741_v16 }
  0xc4   : > { %v430_v21 = vpop.f32.mrf.mxu2 }
  0xc6   : > { %v615_v25 = vpop.f32.mrf.mxu3  ;;  %v699_v29 = vpop.f32.mrf.mxu0 }
  0xc8   : > { %v472_v28 = vpop.f32.mrf.mxu1 }
  0xc9   : > { %1368 = vmatmul.msk.bf16.gmra.mxu2 %vm330_vm1, %v819_v24  ;;  %v473_v30 = vadd.f32 %v472_v28, %v420_v50 }
  0xcb   : > { %1375 = vmatmul.msk.bf16.gmra.mxu3 %vm330_vm1, %v899_v26 }
  0xcc   : > { %v534_v31 = vpop.f32.mrf.mxu2 }
  0xcd   : > { %v559_v32 = vadd.f32 %v534_v31, %v466_v61 }
  0xce   : > { %v618_v33 = vpop.f32.mrf.mxu3  ;;  %v702_v40 = vpop.f32.mrf.mxu0 }
  0xcf   : > { %v638_v34 = vadd.f32 %v613_v14, %v559_v32 }
  0xd0   : > { %v475_v36 = vpop.f32.mrf.mxu1 }
  0xd1   : > { %v476_v37 = vadd.f32 %v475_v36, %v423_v53  ;;  %v1664_v38 = vadd.f32 %v692_v58, %v638_v34 }
  0xd4   : > { %v536_v41 = vpop.f32.mrf.mxu2 }
  0xd5   : > { %v560_v42 = vadd.f32 %v536_v41, %v468_v7 }
  0xd6   : > { %v620_v44 = vpop.f32.mrf.mxu3  ;;  %v704_v50 = vpop.f32.mrf.mxu0 }
  0xd7   : > { %v639_v45 = vadd.f32 %v615_v25, %v560_v42 }
  0xd8   : > { %v477_v46 = vpop.f32.mrf.mxu1 }
  0xd9   : > { %1369 = vmatmul.msk.bf16.gmra.mxu2 %vm330_vm1, %v820_v43  ;;  %v478_v47 = vadd.f32 %v477_v46, %v425_v62  ;;  %v1667_v48 = vadd.f32 %v694_v3, %v639_v45 }
  0xdc   : > { %v539_v49 = vpop.f32.mrf.mxu2 }
  0xdd   : > { %v561_v51 = vadd.f32 %v539_v49, %v471_v20  ;;  %v1056_v49 = vpop.permute.xlu0 %1055 }
  0xde   : > { %v623_v53 = vpop.f32.mrf.mxu3  ;;  %v707_v62 = vpop.f32.mrf.mxu0 }
  0xdf   : > { %v640_v54 = vadd.f32 %v618_v33, %v561_v51 }
  0xe0   : > { %v480_v55 = vpop.f32.mrf.mxu1 }
  0xe1   : > { %v481_v56 = vadd.f32 %v480_v55, %v428_v10  ;;  %v1672_v58 = vadd.f32 %v697_v15, %v640_v54 }
  0xe4   : > { %v541_v59 = vpop.f32.mrf.mxu2 }
  0xe5   : > { %v562_v60 = vadd.f32 %v541_v59, %v473_v30 }
  0xe6   : > { %v625_v61 = vpop.f32.mrf.mxu3  ;;  %v709_v9 = vpop.f32.mrf.mxu0 }
  0xe7   : > { %v641_v63 = vadd.f32 %v620_v44, %v562_v60 }
  0xe8   : > { %v482_v0 = vpop.f32.mrf.mxu1 }
  0xe9   : > { %v483_v1 = vadd.f32 %v482_v0, %v430_v21  ;;  %v1674_v3 = vadd.f32 %v699_v29, %v641_v63 }
  0xec   : > { %v544_v4 = vpop.f32.mrf.mxu2 }
  0xed   : > { %v563_v5 = vadd.f32 %v544_v4, %v476_v37 }
  0xee   : > { %v628_v6 = vpop.f32.mrf.mxu3  ;;  %v712_v19 = vpop.f32.mrf.mxu0 }
  0xef   : > { %v642_v7 = vadd.f32 %v623_v53, %v563_v5 }
  0xf0   : > { %v485_v8 = vpop.f32.mrf.mxu1 }
  0xf1   : > { %v486_v11 = vadd.f32 %v485_v8, %v1637_v57  ;;  %v1677_v10 = vadd.f32 %v702_v40, %v642_v7 }
  0xf4   : > { %v546_v12 = vpop.f32.mrf.mxu2 }
  0xf5   : > { %v564_v13 = vadd.f32 %v546_v12, %v478_v47  ;;  %v1066_v12 = vpop.permute.xlu1 %1065 }
  0xf6   : > { %v630_v14 = vpop.f32.mrf.mxu3  ;;  %v714_v57 = vpop.f32.mrf.mxu0 }
  0xf7   : > { %v643_v15 = vadd.f32 %v625_v61, %v564_v13 }
  0xf8   : > { %v487_v16 = vpop.f32.mrf.mxu1 }
  0xf9   : > { %v488_v17 = vadd.f32 %v487_v16, %v1641_v2  ;;  %v1680_v18 = vadd.f32 %v704_v50, %v643_v15 }
  0xfc   : > { %v549_v20 = vpop.f32.mrf.mxu2 }
  0xfd   : > { %v565_v21 = vadd.f32 %v549_v20, %v481_v56 }
  0xfe   : > { %v633_v22 = vpop.f32.mrf.mxu3  ;;  %v1008_v33 = vpop.f32.mrf.mxu0 }
  0xff   : > { %v644_v23 = vadd.f32 %v628_v6, %v565_v21 }
 0x100   : > { %v771_v27 = vpop.f32.mrf.mxu1 }
 0x101   : > { %v1682_v24 = vadd.f32 %v707_v62, %v644_v23  ;;  %v796_v45 = vadd.f32 %v771_v27, %v1664_v38  ;;  %v1061_v62 = vpop.permute.xlu0 %1060 }
 0x104   : > { %v551_v25 = vpop.f32.mrf.mxu2 }
 0x105   : > { %v566_v26 = vadd.f32 %v551_v25, %v483_v1 }
 0x106   : > { %v635_v28 = vpop.f32.mrf.mxu3  ;;  %v1010_v42 = vpop.f32.mrf.mxu0 }
 0x107   : > { %v645_v29 = vadd.f32 %v630_v14, %v566_v26 }
 0x108   : > { %v773_v35 = vpop.f32.mrf.mxu1 }
 0x109   : > { %v1684_v30 = vadd.f32 %v709_v9, %v645_v29  ;;  %v797_v54 = vadd.f32 %v773_v35, %v1667_v48 }
 0x10c   : > { %v554_v31 = vpop.f32.mrf.mxu2 }
 0x10d   : > { %v567_v32 = vadd.f32 %v554_v31, %v486_v11  ;;  %v1071_v31 = vpop.permute.xlu1 %1070 }
 0x10e   : > { %v929_v2 = vpop.f32.mrf.mxu3  ;;  %v1013_v53 = vpop.f32.mrf.mxu0 }
 0x10f   : > { %v646_v34 = vadd.f32 %v633_v22, %v567_v32 }
 0x110   : > { %v776_v44 = vpop.f32.mrf.mxu1 }
 0x111   : > { %v1686_v36 = vadd.f32 %v712_v19, %v646_v34  ;;  %v798_v38 = vadd.f32 %v776_v44, %v1672_v58  ;;  %v1076_v44 = vpop.permute.xlu2 %1075 }
 0x114   : > { %v556_v37 = vpop.f32.mrf.mxu2 }
 0x115   : > { %v568_v39 = vadd.f32 %v556_v37, %v488_v17 }
 0x116   : > { %v931_v40 = vpop.f32.mrf.mxu3  ;;  %v1015_v5 = vpop.f32.mrf.mxu0 }
 0x117   : > { %v647_v41 = vadd.f32 %v635_v28, %v568_v39 }
 0x118   : > { %v778_v55 = vpop.f32.mrf.mxu1 }
 0x119   : > { %v1688_v43 = vadd.f32 %v714_v57, %v647_v41  ;;  %v799_v19 = vadd.f32 %v778_v55, %v1674_v3 }
 0x11c   : > { %v850_v46 = vpop.f32.mrf.mxu2 }
 0x11d   : > { %v875_v47 = vadd.f32 %v850_v46, %v796_v45 }
 0x11e   : > { %v934_v51 = vpop.f32.mrf.mxu3  ;;  %v1018_v26 = vpop.f32.mrf.mxu0 }
 0x11f   : > { %v954_v50 = vadd.f32 %v929_v2, %v875_v47 }
 0x120   : > { %v781_v11 = vpop.f32.mrf.mxu1 }
 0x121   : > { %v1033_v52 = vadd.f32 %v1008_v33, %v954_v50  ;;  %v800_v34 = vadd.f32 %v781_v11, %v1677_v10 }
 0x123   : > { %v1103_v59 = vmul.f32 %v1056_v49, %v1033_v52 }
 0x124   : > { %v852_v56 = vpop.f32.mrf.mxu2 }
 0x125   : > { %v876_v60 = vadd.f32 %v852_v56, %v797_v54  ;;  %v1113_v63 = vpack.c.bf16 %v1103_v59, %v1103_v59 }
 0x126   : > { %v936_v1 = vpop.f32.mrf.mxu3  ;;  %v1020_v47 = vpop.f32.mrf.mxu0 }
 0x127   : > { %v955_v61 = vadd.f32 %v931_v40, %v876_v60  ;;  %v1133_v6 = vunpack.c.l.bf16 %v1113_v63  ;;  %v1081_v63 = vpop.permute.xlu2 %1080 }
 0x128   : > { %v783_v29 = vpop.f32.mrf.mxu1 }
 0x129   : > { %v1034_v0 = vadd.f32 %v1010_v42, %v955_v61  ;;  %v1159_v15 = vmul.f32 %v1133_v6, %v1133_v6 }
 0x12b   : > { %v1104_v4 = vmul.f32 %v1061_v62, %v1034_v0 }
 0x12c   : > { %v855_v48 = vpop.f32.mrf.mxu2 }
 0x12d   : > { %v1114_v7 = vpack.c.bf16 %v1104_v4, %v1104_v4  ;;  %v1388_v8 = vpack.c.bf16 %v1104_v4, %v1103_v59  ;;  %v877_v9 = vadd.f32 %v855_v48, %v798_v38 }
 0x12e   : > { %v939_v23 = vpop.f32.mrf.mxu3  ;;  %v1023_v4 = vpop.f32.mrf.mxu0 }
 0x12f   : > { %1389 = vst [vmem:[%s1697_s17] sm:$0xff] %v1388_v8   ;;  %v1134_v13 = vunpack.c.l.bf16 %v1114_v7  ;;  %v956_v14 = vadd.f32 %v934_v51, %v877_v9 }
 0x130   : > { %v786_v52 = vpop.f32.mrf.mxu1 }
 0x131   : > { %v1143_v58 = vadd.f32 %v1134_v13, %v1133_v6  ;;  %v1160_v16 = vmul.f32 %v1134_v13, %v1134_v13  ;;  %v1035_v17 = vadd.f32 %v1013_v53, %v956_v14  ;;  %v801_v53 = vadd.f32 %v783_v29, %v1680_v18 }
 0x132   : > { %v802_v48 = vadd.f32 %v786_v52, %v1682_v24 }
 0x133   : > { %v1169_v20 = vadd.f32 %v1160_v16, %v1159_v15  ;;  %v1105_v21 = vmul.f32 %v1066_v12, %v1035_v17  ;;  %v1086_v16 = vpop.permute.xlu0 %1085 }
 0x134   : > { %v857_v22 = vpop.f32.mrf.mxu2 }
 0x135   : > { %v1115_v25 = vpack.c.bf16 %v1105_v21, %v1105_v21  ;;  %v878_v57 = vadd.f32 %v857_v22, %v799_v19 }
 0x136   : > { %v941_v42 = vpop.f32.mrf.mxu3  ;;  %v1025_v24 = vpop.f32.mrf.mxu0 }
 0x137   : > { %v1135_v27 = vunpack.c.l.bf16 %v1115_v25  ;;  %v957_v28 = vadd.f32 %v936_v1, %v878_v57 }
 0x138   : > { %v788_v7 = vpop.f32.mrf.mxu1 }
 0x139   : > { %v1144_v32 = vadd.f32 %v1143_v58, %v1135_v27  ;;  %v1161_v2 = vmul.f32 %v1135_v27, %v1135_v27  ;;  %v1036_v33 = vadd.f32 %v1015_v5, %v957_v28  ;;  %v803_v19 = vadd.f32 %v788_v7, %v1684_v30 }
 0x13b   : > { %v1170_v35 = vadd.f32 %v1169_v20, %v1161_v2  ;;  %v1106_v37 = vmul.f32 %v1071_v31, %v1036_v33 }
 0x13c   : > { %v860_v3 = vpop.f32.mrf.mxu2 }
 0x13d   : > { %v1116_v39 = vpack.c.bf16 %v1106_v37, %v1106_v37  ;;  %v1393_v40 = vpack.c.bf16 %v1106_v37, %v1105_v21  ;;  %v879_v41 = vadd.f32 %v860_v3, %v800_v34 }
 0x13e   : > { %v944_v62 = vpop.f32.mrf.mxu3 }
 0x13f   : > { %1410 = vst [vmem:[%s1697_s17 + $0x8] sm:$0xff] %v1393_v40   ;;  %v1136_v45 = vunpack.c.l.bf16 %v1116_v39  ;;  %v958_v46 = vadd.f32 %v939_v23, %v879_v41  ;;  %v1028_v40 = vpop.f32.mrf.mxu0 }
 0x140   : > { %v791_v57 = vpop.f32.mrf.mxu1 }
 0x141   : > { %v1145_v49 = vadd.f32 %v1144_v32, %v1136_v45  ;;  %v1162_v50 = vmul.f32 %v1136_v45, %v1136_v45  ;;  %v1037_v51 = vadd.f32 %v1018_v26, %v958_v46  ;;  %v1091_v32 = vpop.permute.xlu1 %1090  ;;  %v804_v2 = vadd.f32 %v791_v57, %v1686_v36 }
 0x143   : > { %v1171_v54 = vadd.f32 %v1170_v35, %v1162_v50  ;;  %v1107_v10 = vmul.f32 %v1076_v44, %v1037_v51 }
 0x144   : > { %v862_v55 = vpop.f32.mrf.mxu2 }
 0x145   : > { %v1117_v56 = vpack.c.bf16 %v1107_v10, %v1107_v10  ;;  %v880_v59 = vadd.f32 %v862_v55, %v801_v53 }
 0x146   : > { %v946_v17 = vpop.f32.mrf.mxu3 }
 0x147   : > { %v1137_v60 = vunpack.c.l.bf16 %v1117_v56  ;;  %v959_v61 = vadd.f32 %v941_v42, %v880_v59  ;;  %v1030_v59 = vpop.f32.mrf.mxu0 }
 0x148   : > { %v793_v44 = vpop.f32.mrf.mxu1 }
 0x149   : > { %v1146_v0 = vadd.f32 %v1145_v49, %v1137_v60  ;;  %v1163_v1 = vmul.f32 %v1137_v60, %v1137_v60  ;;  %v1038_v38 = vadd.f32 %v1020_v47, %v959_v61  ;;  %v1096_v49 = vpop.permute.xlu2 %1095  ;;  %v805_v50 = vadd.f32 %v793_v44, %v1688_v43 }
 0x14b   : > { %v1172_v5 = vadd.f32 %v1171_v54, %v1163_v1  ;;  %v1108_v6 = vmul.f32 %v1081_v63, %v1038_v38  ;;  %v1101_v63 = vpop.permute.xlu0 %1100 }
 0x14c   : > { %v865_v18 = vpop.f32.mrf.mxu2 }
 0x14d   : > { %v1118_v8 = vpack.c.bf16 %v1108_v6, %v1108_v6  ;;  %v1398_v9 = vpack.c.bf16 %v1108_v6, %v1107_v10  ;;  %v881_v11 = vadd.f32 %v865_v18, %v802_v48 }
 0x14e   : > { %v949_v35 = vpop.f32.mrf.mxu3 }
 0x14f   : > { %1411 = vst [vmem:[%s1697_s17 + $0x10] sm:$0xff] %v1398_v9   ;;  %v1138_v12 = vunpack.c.l.bf16 %v1118_v8  ;;  %v960_v13 = vadd.f32 %v944_v62, %v881_v11 }
 0x151   : > { %v1147_v14 = vadd.f32 %v1146_v0, %v1138_v12  ;;  %v1164_v15 = vmul.f32 %v1138_v12, %v1138_v12  ;;  %v1039_v58 = vadd.f32 %v1023_v4, %v960_v13 }
 0x153   : > { %v1173_v20 = vadd.f32 %v1172_v5, %v1164_v15  ;;  %v1109_v21 = vmul.f32 %v1086_v16, %v1039_v58 }
 0x154   : > { %v867_v22 = vpop.f32.mrf.mxu2 }
 0x155   : > { %v882_v23 = vadd.f32 %v867_v22, %v803_v19  ;;  %v1119_v25 = vpack.c.bf16 %v1109_v21, %v1109_v21 }
 0x156   : > { %v951_v10 = vpop.f32.mrf.mxu3 }
 0x157   : > { %v961_v26 = vadd.f32 %v946_v17, %v882_v23  ;;  %v1139_v27 = vunpack.c.l.bf16 %v1119_v25 }
 0x159   : > { %v1040_v28 = vadd.f32 %v1025_v24, %v961_v26  ;;  %v1148_v29 = vadd.f32 %v1147_v14, %v1139_v27  ;;  %v1165_v31 = vmul.f32 %v1139_v27, %v1139_v27 }
 0x15b   : > { %v1110_v33 = vmul.f32 %v1091_v32, %v1040_v28  ;;  %v1174_v34 = vadd.f32 %v1173_v20, %v1165_v31 }
 0x15c   : > { %v870_v30 = vpop.f32.mrf.mxu2 }
 0x15d   : > { %v1120_v37 = vpack.c.bf16 %v1110_v33, %v1110_v33  ;;  %v1403_v3 = vpack.c.bf16 %v1110_v33, %v1109_v21  ;;  %v883_v39 = vadd.f32 %v870_v30, %v804_v2 }
 0x15f   : > { %1412 = vst [vmem:[%s1697_s17 + $0x18] sm:$0xff] %v1403_v3   ;;  %v1140_v41 = vunpack.c.l.bf16 %v1120_v37  ;;  %v962_v42 = vadd.f32 %v949_v35, %v883_v39 }
 0x161   : > { %v1149_v45 = vadd.f32 %v1148_v29, %v1140_v41  ;;  %v1166_v46 = vmul.f32 %v1140_v41, %v1140_v41  ;;  %v1041_v47 = vadd.f32 %v1028_v40, %v962_v42 }
 0x163   : > { %v1175_v51 = vadd.f32 %v1174_v34, %v1166_v46  ;;  %v1111_v36 = vmul.f32 %v1096_v49, %v1041_v47 }
 0x164   : > { %v872_v52 = vpop.f32.mrf.mxu2 }
 0x165   : > { %v1121_v53 = vpack.c.bf16 %v1111_v36, %v1111_v36  ;;  %v884_v54 = vadd.f32 %v872_v52, %v805_v50 }
 0x167   : > { %v1141_v55 = vunpack.c.l.bf16 %v1121_v53  ;;  %v963_v56 = vadd.f32 %v951_v10, %v884_v54 }
 0x169   : > { %v1150_v60 = vadd.f32 %v1149_v45, %v1141_v55  ;;  %v1167_v61 = vmul.f32 %v1141_v55, %v1141_v55  ;;  %v1042_v62 = vadd.f32 %v1030_v59, %v963_v56 }
 0x16b   : > { %v1176_v0 = vadd.f32 %v1175_v51, %v1167_v61  ;;  %v1112_v1 = vmul.f32 %v1101_v63, %v1042_v62 }
 0x16d   : > { %v1122_v38 = vpack.c.bf16 %v1112_v1, %v1112_v1  ;;  %v1408_v4 = vpack.c.bf16 %v1112_v1, %v1111_v36 }
 0x16f   : > { %1413 = vst [vmem:[%s1697_s17 + $0x20] sm:$0xff] %v1408_v4   ;;  %v1142_v43 = vunpack.c.l.bf16 %v1122_v38 }
 0x171   : > { %v1151_v48 = vadd.f32 %v1150_v60, %v1142_v43  ;;  %v1168_v5 = vmul.f32 %v1142_v43, %v1142_v43 }
 0x173   : > { %v1152_v6 = vrot.slane %v1151_v48, 4  ;;  %v1177_v7 = vadd.f32 %v1176_v0, %v1168_v5 }
 0x175   : > { %v1153_v18 = vadd.f32 %v1152_v6, %v1151_v48  ;;  %v1178_v8 = vrot.slane %v1177_v7, 4 }
 0x177   : > { %v1154_v9 = vrot.slane %v1153_v18, 2  ;;  %v1179_v11 = vadd.f32 %v1178_v8, %v1177_v7 }
 0x179   : > { %v1155_v12 = vadd.f32 %v1154_v9, %v1153_v18  ;;  %v1180_v13 = vrot.slane %v1179_v11, 2 }
 0x17b   : > { %v1156_v14 = vrot.slane %v1155_v12, 1  ;;  %v1181_v15 = vadd.f32 %v1180_v13, %v1179_v11 }
 0x17d   : > { %v1157_v58 = vadd.f32 %v1156_v14, %v1155_v12  ;;  %v1182_v16 = vrot.slane %v1181_v15, 1 }
 0x17f   : > { %1158 = vst [vmem:[%s238_s22] sm:$0x1] %v1157_v58  ;;  %v1183_v17 = vadd.f32 %v1182_v16, %v1181_v15 }
 0x181   : > { %1184 = vst [vmem:[%s241_s25] sm:$0x1] %v1183_v17 }
 0x182 PF: > { %s16_s18 = sadd.s32 1, %s1437_s18  }
 0x183   : > { %p13_p4 = scmp.ge.s32.totalorder %s16_s18, 4  }
 0x185   :  { %15 = sbr.rel (!%p13_p4) target bundleno = 1 (0x1), region = 125 }

// kernel: down_forward.4
= control target key start
LH: loop header
LB: loop body
LE: loop exit
PB: predicated region body
PF: predicated region fallthrough
CT: control target
= control target key end

     0   :  { %s2421_s24 = smov 0   ;;  %s2878_s0 = inlined_call_operand.vmem [shape: bf16[2,80,128], index: 0, kind: input, shape index: {}]   ;;  %s2879_s1 = inlined_call_operand.vmem [shape: f32[1,128], index: 1, kind: input, shape index: {}]   ;;  %s2880_s2 = inlined_call_operand.vmem [shape: f32[1,128], index: 2, kind: input, shape index: {}]   ;;  %s2881_s3 = inlined_call_operand.vmem [shape: bf16[9,128,128], index: 3, kind: input, shape index: {}]   ;;  %s2882_s4 = inlined_call_operand.vmem [shape: f32[80,1], index: 4, kind: input, shape index: {}]   ;;  %s2883_s5 = inlined_call_operand.vmem [shape: bf16[2,80,128], index: 5, kind: output, shape index: {0}]   ;;  %s2884_s6 = inlined_call_operand.vmem [shape: f32[2,1,128], index: 6, kind: output, shape index: {1}]   ;;  %s2885_s7 = inlined_call_operand.vmem [shape: f32[2,1,128], index: 7, kind: output, shape index: {2}]  }
   0x1 LB: > { %s1789_s25 = sadd.s32 4294967295, %s2377_s24   ;;  %p1793_p0 = scmp.ge.s32.totalorder %s2377_s24, 1  ;;  %s2377_s24 = sphi %s2421_s24, %s18_s24  }
   0x2   : > { %p242_p1 = scmp.lt.s32.totalorder %s2377_s24, 3 }
   0x4   : > { %p243_p2 = pnand %p1793_p0, %p242_p1 }
   0x5   : > { %p280_p3 = scmp.lt.s32.totalorder (!%p243_p2), %s1789_s25, 1 }
   0x6   : > { %246 = sbr.rel (%p243_p2) target bundleno = 490 (0x1ea), region = 40 }
   0xb   : > { %v360_v0 = vld [vmem:[%s2882_s4 + $0x30] sm:$0xff]  ;;  %v358_v1 = vld [vmem:[%s2882_s4 + $0x20] sm:$0xff]  ;;  %v2379_v3 = vmov 0   ;;  %v361_v4 = vld [vmem:[%s2882_s4 + $0x38] sm:$0xff]  ;;  %v2380_v10 = vmov 0.0   ;;  %s2887_s25 = smov (!%p280_p3, %s1789_s25), 1 }
   0xc   : > { %v356_v2 = vld [vmem:[%s2882_s4 + $0x10] sm:$0xff]  ;;  %2368 = vset.pattern.permute.xlu2 %v2379_v3  ;;  %2367 = vset.pattern.permute.xlu1 %v2379_v3  ;;  %v357_v5 = vld [vmem:[%s2882_s4 + $0x18] sm:$0xff]  ;;  %v354_v6 = vld [vmem:[%s2882_s4] sm:$0xff]  ;;  %431 = vst [vmem:[#allocation2 + $0x38] sm:$0xff] %v2380_v10  ;;  %s2355_s27 = smul.u32 40, %s2887_s25  ;;  %s292_s20 = scalar_lea.vmem %s2884_s6, %s2887_s25 }
   0xd   : > { %2366 = vset.pattern.permute.xlu0 %v2379_v3  ;;  %396 = vperm.xlu2 %2368, %v360_v0   ;;  %v355_v7 = vld [vmem:[%s2882_s4 + $0x8] sm:$0xff]  ;;  %v362_v8 = vld [vmem:[%s2882_s4 + $0x40] sm:$0xff]  ;;  %432 = vst [vmem:[#allocation2 + $0x40] sm:$0xff] %v2380_v10  ;;  %v2229_v12 = vld [vmem:[%s2881_s3 + $0x78] sm:$0xff]  ;;  %s295_s23 = scalar_lea.vmem %s2885_s7, %s2887_s25 }
   0xe   : > { %386 = vperm.xlu1 %2367, %v358_v1   ;;  %376 = vperm.xlu0 %2366, %v356_v2   ;;  %v359_v9 = vld [vmem:[%s2882_s4 + $0x28] sm:$0xff]  ;;  %424 = vst [vmem:[#allocation2] sm:$0xff] %v2380_v10  ;;  %v2228_v13 = vld [vmem:[%s2881_s3 + $0x70] sm:$0xff]  ;;  %v2245_v14 = vld [vmem:[%s2881_s3 + $0xf8] sm:$0xff]  ;;  %s2493_s11 = scalar_lea.vmem %s2878_s0, %s2355_s27  ;;  %s2853_s18 = scalar_lea.vmem %s2883_s5, %s2355_s27 }
   0xf   : > { %425 = vst [vmem:[#allocation2 + $0x8] sm:$0xff] %v2380_v10  ;;  %v363_v11 = vld [vmem:[%s2882_s4 + $0x48] sm:$0xff]  ;;  %2340 = vmatpush.bf16.msra.mxu2 %v2229_v12  ;;  %558 = vmatpush.bf16.msra.mxu0 %v2229_v12  ;;  %v2333_v15 = vld [vmem:[%s2493_s11 + $0x18] sm:$0xff]   ;;  %v2244_v18 = vld [vmem:[%s2881_s3 + $0xf0] sm:$0xff] }
  0x10   : > { %426 = vst [vmem:[#allocation2 + $0x10] sm:$0xff] %v2380_v10  ;;  %2339 = vmatpush.bf16.msra.mxu1 %v2229_v12  ;;  %878 = vmatpush.bf16.msra.mxu3 %v2245_v14  ;;  %v2227_v16 = vld [vmem:[%s2881_s3 + $0x68] sm:$0xff]  ;;  %v2300_v17 = vunpack.c.l.bf16 %v2333_v15  ;;  %v2505_v19 = vld [vmem:[%s2879_s1] ss:$0 sm:$0xff]  ;;  %v2301_v25 = vunpack.c.h.bf16 %v2333_v15  ;;  %v2225_v26 = vld [vmem:[%s2881_s3 + $0x58] sm:$0xff] }
  0x11   : > { %427 = vst [vmem:[#allocation2 + $0x18] sm:$0xff] %v2380_v10  ;;  %v2226_v20 = vld [vmem:[%s2881_s3 + $0x60] sm:$0xff]  ;;  %v2243_v21 = vld [vmem:[%s2881_s3 + $0xe8] sm:$0xff]  ;;  %v2224_v30 = vld [vmem:[%s2881_s3 + $0x50] sm:$0xff] }
  0x12   : > { %428 = vst [vmem:[#allocation2 + $0x20] sm:$0xff] %v2380_v10  ;;  %v326_v22 = vmul.f32 %v2505_v19, %v2300_v17  ;;  %v2517_v23 = vld [vmem:[%s2880_s2] ss:$0 sm:$0xff]  ;;  %v327_v29 = vmul.f32 %v2505_v19, %v2301_v25  ;;  %v2241_v31 = vld [vmem:[%s2881_s3 + $0xd8] sm:$0xff]  ;;  %v2223_v37 = vld [vmem:[%s2881_s3 + $0x48] sm:$0xff] }
  0x13   : > { %429 = vst [vmem:[#allocation2 + $0x28] sm:$0xff] %v2380_v10  ;;  %2342 = vmatpush.bf16.msra.mxu2 %v2228_v13  ;;  %559 = vmatpush.bf16.msra.mxu0 %v2228_v13  ;;  %v2242_v27 = vld [vmem:[%s2881_s3 + $0xe0] sm:$0xff]  ;;  %v2240_v38 = vld [vmem:[%s2881_s3 + $0xd0] sm:$0xff]  ;;  %v2237_v42 = vld [vmem:[%s2881_s3 + $0xb8] sm:$0xff] }
  0x14   : > { %430 = vst [vmem:[#allocation2 + $0x30] sm:$0xff] %v2380_v10  ;;  %2341 = vmatpush.bf16.msra.mxu1 %v2228_v13  ;;  %879 = vmatpush.bf16.msra.mxu3 %v2244_v18  ;;  %v340_v24 = vadd.f32 %v2517_v23, %v326_v22  ;;  %v2534_v32 = vld [vmem:[%s2493_s11] sm:$0xff]   ;;  %v341_v35 = vadd.f32 %v2517_v23, %v327_v29  ;;  %v2239_v43 = vld [vmem:[%s2881_s3 + $0xc8] sm:$0xff]  ;;  %v2558_v44 = vld [vmem:[%s2493_s11 + $0x10] sm:$0xff]  }
  0x15   : > { %401 = vperm.xlu2 %2368, %v361_v4   ;;  %433 = vst [vmem:[#allocation2 + $0x48] sm:$0xff] %v2380_v10  ;;  %v2289_v36 = vunpack.c.h.bf16 %v2534_v32  ;;  %v2222_v41 = vld [vmem:[%s2881_s3 + $0x40] sm:$0xff]  ;;  %v2331_v45 = vld [vmem:[%s2493_s11 + $0x8] sm:$0xff]   ;;  %v2296_v49 = vunpack.c.l.bf16 %v2558_v44  ;;  %v2236_v51 = vld [vmem:[%s2881_s3 + $0xb0] sm:$0xff] }
  0x16   : > { %381 = vperm.xlu0 %2366, %v357_v5   ;;  %366 = vperm.xlu1 %2367, %v354_v6   ;;  %434 = vst [vmem:[#allocation2 + $0x50] sm:$0xff] %v2380_v10  ;;  %v350_v28 = vmax.f32 %v340_v24, 0.0  ;;  %v351_v39 = vmax.f32 %v341_v35, 0.0  ;;  %v2292_v50 = vunpack.c.l.bf16 %v2331_v45  ;;  %v2238_v52 = vld [vmem:[%s2881_s3 + $0xc0] sm:$0xff]  ;;  %v2221_v57 = vld [vmem:[%s2881_s3 + $0x38] sm:$0xff]  ;;  %v2235_v58 = vld [vmem:[%s2881_s3 + $0xa8] sm:$0xff]  ;;  %v2293_v62 = vunpack.c.h.bf16 %v2331_v45 }
  0x17   : > { %435 = vst [vmem:[#allocation2 + $0x58] sm:$0xff] %v2380_v10  ;;  %2344 = vmatpush.bf16.msra.mxu2 %v2227_v16  ;;  %560 = vmatpush.bf16.msra.mxu0 %v2227_v16  ;;  %v321_v40 = vmul.f32 %v2505_v19, %v2289_v36  ;;  %v324_v55 = vmul.f32 %v2505_v19, %v2296_v49  ;;  %v2253_v59 = vld [vmem:[%s2881_s3 + $0x138] sm:$0xff]  ;;  %v2234_v3 = vld [vmem:[%s2881_s3 + $0xa0] sm:$0xff]  ;;  %v2251_v13 = vld [vmem:[%s2881_s3 + $0x128] sm:$0xff] }
  0x18   : > { %436 = vst [vmem:[#allocation2 + $0x60] sm:$0xff] %v2380_v10  ;;  %2343 = vmatpush.bf16.msra.mxu1 %v2227_v16  ;;  %880 = vmatpush.bf16.msra.mxu3 %v2243_v21  ;;  %v322_v56 = vmul.f32 %v2505_v19, %v2292_v50  ;;  %v2233_v12 = vld [vmem:[%s2881_s3 + $0x98] sm:$0xff]  ;;  %v2218_v18 = vld [vmem:[%s2881_s3 + $0x20] sm:$0xff]  ;;  %v2215_v45 = vld [vmem:[%s2881_s3 + $0x8] sm:$0xff] }
  0x19   : > { %v335_v48 = vadd.f32 %v2517_v23, %v321_v40  ;;  %v338_v63 = vadd.f32 %v2517_v23, %v324_v55  ;;  %v2250_v21 = vld [vmem:[%s2881_s3 + $0x120] sm:$0xff]  ;;  %v2247_v50 = vld [vmem:[%s2881_s3 + $0x108] sm:$0xff] }
  0x1b   : > { %2346 = vmatpush.bf16.msra.mxu2 %v2226_v20  ;;  %561 = vmatpush.bf16.msra.mxu0 %v2226_v20  ;;  %v345_v54 = vmax.f32 %v335_v48, 0.0 }
  0x1c   : > { %2345 = vmatpush.bf16.msra.mxu1 %v2226_v20  ;;  %881 = vmatpush.bf16.msra.mxu3 %v2242_v27  ;;  %v2232_v20 = vld [vmem:[%s2881_s3 + $0x90] sm:$0xff] }
  0x1d   : > { %371 = vperm.xlu2 %2368, %v355_v7  }
  0x1e   : > { %406 = vperm.xlu0 %2366, %v362_v8   ;;  %391 = vperm.xlu1 %2367, %v359_v9  }
  0x1f   : > { %2348 = vmatpush.bf16.msra.mxu2 %v2225_v26  ;;  %562 = vmatpush.bf16.msra.mxu0 %v2225_v26 }
  0x20   : > { %2347 = vmatpush.bf16.msra.mxu1 %v2225_v26  ;;  %882 = vmatpush.bf16.msra.mxu3 %v2241_v31  ;;  %v2297_v26 = vunpack.c.h.bf16 %v2558_v44  ;;  %v2217_v31 = vld [vmem:[%s2881_s3 + $0x18] sm:$0xff]  ;;  %v2248_v44 = vld [vmem:[%s2881_s3 + $0x110] sm:$0xff] }
  0x23   : > { %2350 = vmatpush.bf16.msra.mxu2 %v2224_v30  ;;  %563 = vmatpush.bf16.msra.mxu0 %v2224_v30 }
  0x24   : > { %2349 = vmatpush.bf16.msra.mxu1 %v2224_v30  ;;  %883 = vmatpush.bf16.msra.mxu3 %v2240_v38  ;;  %v325_v30 = vmul.f32 %v2505_v19, %v2297_v26  ;;  %v2216_v38 = vld [vmem:[%s2881_s3 + $0x10] sm:$0xff] }
  0x25   : > { %1559 = vperm.xlu2 %2368, %v355_v7   ;;  %v348_v7 = vmax.f32 %v338_v63, 0.0 }
  0x26   : > { %411 = vperm.xlu0 %2366, %v363_v11   ;;  %1554 = vperm.xlu1 %2367, %v354_v6   ;;  %v2334_v6 = vld [vmem:[%s2493_s11 + $0x20] sm:$0xff]  }
  0x27   : > { %2352 = vmatpush.bf16.msra.mxu2 %v2223_v37  ;;  %564 = vmatpush.bf16.msra.mxu0 %v2223_v37  ;;  %v2304_v17 = vunpack.c.l.bf16 %v2334_v6 }
  0x28   : > { %2351 = vmatpush.bf16.msra.mxu1 %v2223_v37  ;;  %884 = vmatpush.bf16.msra.mxu3 %v2239_v43  ;;  %v2305_v43 = vunpack.c.h.bf16 %v2334_v6  ;;  %v2261_v6 = vld [vmem:[%s2881_s3 + $0x178] sm:$0xff] }
  0x29   : > { %v328_v27 = vmul.f32 %v2505_v19, %v2304_v17  ;;  %v2260_v17 = vld [vmem:[%s2881_s3 + $0x170] sm:$0xff] }
  0x2a   : > { %v329_v49 = vmul.f32 %v2505_v19, %v2305_v43  ;;  %v2274_v43 = vld [vmem:[%s2881_s3 + $0x1e0] sm:$0xff] }
  0x2b   : > { %2354 = vmatpush.bf16.msra.mxu2 %v2222_v41  ;;  %565 = vmatpush.bf16.msra.mxu0 %v2222_v41  ;;  %v342_v37 = vadd.f32 %v2517_v23, %v328_v27 }
  0x2c   : > { %2353 = vmatpush.bf16.msra.mxu1 %v2222_v41  ;;  %885 = vmatpush.bf16.msra.mxu3 %v2238_v52 }
  0x2d   : > { %1574 = vperm.xlu2 %2368, %v358_v1   ;;  %v2288_v1 = vunpack.c.l.bf16 %v2534_v32  ;;  %v2231_v32 = vld [vmem:[%s2881_s3 + $0x88] sm:$0xff] }
  0x2e   : > { %1564 = vperm.xlu0 %2366, %v356_v2   ;;  %1569 = vperm.xlu1 %2367, %v357_v5   ;;  %v2220_v2 = vld [vmem:[%s2881_s3 + $0x30] sm:$0xff]  ;;  %v323_v5 = vmul.f32 %v2505_v19, %v2293_v62 }
  0x2f   : > { %754 = vmatpush.bf16.msrb.mxu2 %v2237_v42  ;;  %1002 = vmatpush.bf16.msrb.mxu0 %v2253_v59  ;;  %v339_v42 = vadd.f32 %v2517_v23, %v325_v30  ;;  %v2277_v59 = vld [vmem:[%s2881_s3 + $0x1f8] sm:$0xff] }
  0x30   : > { %640 = vmatpush.bf16.msrb.mxu1 %v2221_v57  ;;  %v337_v16 = vadd.f32 %v2517_v23, %v323_v5  ;;  %v478_v57 = vld [vmem:[#allocation2 + $0x1] sm:$0xff]  ;;  %1374 = vmatpush.bf16.msrb.mxu3 %v2277_v59  ;;  %v2281_v59 = vld [vmem:[%s2881_s3 + $0x218] sm:$0xff] }
  0x31   : > { %v349_v48 = vmax.f32 %v339_v42, 0.0  ;;  %v2283_v42 = vld [vmem:[%s2881_s3 + $0x228] sm:$0xff] }
  0x33   : > { %755 = vmatpush.bf16.msrb.mxu2 %v2236_v51 }
  0x34   : > { %641 = vmatpush.bf16.msrb.mxu1 %v2220_v2 }
  0x35   : > { %1589 = vperm.xlu2 %2368, %v361_v4   ;;  %v2252_v4 = vld [vmem:[%s2881_s3 + $0x130] sm:$0xff] }
  0x36   : > { %1579 = vperm.xlu0 %2366, %v359_v9   ;;  %1584 = vperm.xlu1 %2367, %v360_v0   ;;  %v336_v0 = vadd.f32 %v2517_v23, %v322_v56  ;;  %v320_v9 = vmul.f32 %v2505_v19, %v2288_v1  ;;  %v2246_v19 = vld [vmem:[%s2881_s3 + $0x100] sm:$0xff] }
  0x37   : > { %756 = vmatpush.bf16.msrb.mxu2 %v2235_v58  ;;  %1003 = vmatpush.bf16.msrb.mxu0 %v2252_v4  ;;  %v343_v58 = vadd.f32 %v2517_v23, %v329_v49 }
  0x38   : > { %v334_v25 = vadd.f32 %v2517_v23, %v320_v9 }
  0x39   : > { %v353_v5 = vmax.f32 %v343_v58, 0.0  ;;  %v2271_v58 = vld [vmem:[%s2881_s3 + $0x1c8] sm:$0xff] }
  0x3a   : > { %v344_v29 = vmax.f32 %v334_v25, 0.0 }
  0x3b   : > { %757 = vmatpush.bf16.msrb.mxu2 %v2234_v3  ;;  %1004 = vmatpush.bf16.msrb.mxu0 %v2251_v13  ;;  %v2269_v13 = vld [vmem:[%s2881_s3 + $0x1b8] sm:$0xff] }
  0x3e   : > { %1594 = vperm.xlu0 %2366, %v362_v8   ;;  %1599 = vperm.xlu1 %2367, %v363_v11   ;;  %v346_v8 = vmax.f32 %v336_v0, 0.0  ;;  %v2219_v11 = vld [vmem:[%s2881_s3 + $0x28] sm:$0xff] }
  0x3f   : > { %642 = vmatpush.bf16.msrb.mxu1 %v2219_v11  ;;  %758 = vmatpush.bf16.msrb.mxu2 %v2233_v12 }
  0x40   : > { %1005 = vmatpush.bf16.msrb.mxu0 %v2250_v21 }
  0x43   : > { %643 = vmatpush.bf16.msrb.mxu1 %v2218_v18  ;;  %759 = vmatpush.bf16.msrb.mxu2 %v2232_v20  ;;  %v2268_v18 = vld [vmem:[%s2881_s3 + $0x1b0] sm:$0xff] }
  0x47   : > { %644 = vmatpush.bf16.msrb.mxu1 %v2217_v31  ;;  %760 = vmatpush.bf16.msrb.mxu2 %v2231_v32  ;;  %v2267_v32 = vld [vmem:[%s2881_s3 + $0x1a8] sm:$0xff] }
  0x4b   : > { %645 = vmatpush.bf16.msrb.mxu1 %v2216_v38 }
  0x4f   : > { %646 = vmatpush.bf16.msrb.mxu1 %v2215_v45 }
  0x67   : > { %v397_v33 = vpop.permute.xlu2 %396 }
  0x68   : > { %v2536_v34 = vmul.f32 %v397_v33, %v350_v28  ;;  %v347_v28 = vmax.f32 %v337_v16, 0.0  ;;  %v2249_v33 = vld [vmem:[%s2881_s3 + $0x118] sm:$0xff]  ;;  %v2276_v16 = vld [vmem:[%s2881_s3 + $0x1f0] sm:$0xff] }
  0x69   : > { %1006 = vmatpush.bf16.msrb.mxu0 %v2249_v33  ;;  %1375 = vmatpush.bf16.msrb.mxu3 %v2276_v16  ;;  %v2284_v33 = vld [vmem:[%s2881_s3 + $0x230] sm:$0xff] }
  0x6a   : > { %443 = vst [vmem:[#allocation2 + $0x3b] sm:$0xff] %v2536_v34 }
  0x6d   : > { %1007 = vmatpush.bf16.msrb.mxu0 %v2248_v44  ;;  %v2258_v44 = vld [vmem:[%s2881_s3 + $0x160] sm:$0xff] }
  0x6f   : > { %v402_v46 = vpop.permute.xlu2 %401 }
  0x70   : > { %v2561_v47 = vmul.f32 %v402_v46, %v351_v39  ;;  %v2230_v39 = vld [vmem:[%s2881_s3 + $0x80] sm:$0xff]  ;;  %v352_v46 = vmax.f32 %v342_v37, 0.0 }
  0x71   : > { %761 = vmatpush.bf16.msrb.mxu2 %v2230_v39  ;;  %1008 = vmatpush.bf16.msrb.mxu0 %v2247_v50  ;;  %v674_v37 = vld [vmem:[#allocation2 + $0x2] sm:$0xff] }
  0x72   : > { %444 = vst [vmem:[#allocation2 + $0x43] sm:$0xff] %v2561_v47  ;;  %v935_v53 = vpack.c.bf16 %v2561_v47, %v2536_v34  ;;  %v2266_v39 = vld [vmem:[%s2881_s3 + $0x1a0] sm:$0xff] }
  0x75   : > { %1009 = vmatpush.bf16.msrb.mxu0 %v2246_v19  ;;  %v2264_v19 = vld [vmem:[%s2881_s3 + $0x190] sm:$0xff] }
  0x77   : > { %v372_v60 = vpop.permute.xlu2 %371 }
  0x78   : > { %v2585_v61 = vmul.f32 %v372_v60, %v345_v54  ;;  %v2214_v54 = vld [vmem:[%s2881_s3] sm:$0xff] }
  0x79   : > { %647 = vmatpush.bf16.msrb.mxu1 %v2214_v54  ;;  %v486_v11 = vld [vmem:[#allocation2 + $0x41] sm:$0xff]  ;;  %v2265_v54 = vld [vmem:[%s2881_s3 + $0x198] sm:$0xff] }
  0x7a   : > { %438 = vst [vmem:[#allocation2 + $0x13] sm:$0xff] %v2585_v61 }
  0x80   : > { %v387_v14 = vpop.permute.xlu1 %386  ;;  %v377_v15 = vpop.permute.xlu0 %376 }
  0x81   : > { %v2622_v22 = vmul.f32 %v387_v14, %v348_v7  ;;  %v2624_v24 = vmul.f32 %v377_v15, %v346_v8  ;;  %v2285_v7 = vld [vmem:[%s2881_s3 + $0x238] sm:$0xff] }
  0x83   : > { %441 = vst [vmem:[#allocation2 + $0x2b] sm:$0xff] %v2622_v22 }
  0x84   : > { %439 = vst [vmem:[#allocation2 + $0x1b] sm:$0xff] %v2624_v24 }
  0x88   : > { %v382_v35 = vpop.permute.xlu0 %381  ;;  %v367_v36 = vpop.permute.xlu1 %366 }
  0x89   : > { %v2648_v40 = vmul.f32 %v382_v35, %v347_v28  ;;  %v2650_v41 = vmul.f32 %v367_v36, %v344_v29  ;;  %v2275_v35 = vld [vmem:[%s2881_s3 + $0x1e8] sm:$0xff] }
  0x8a   : > { %v2259_v36 = vld [vmem:[%s2881_s3 + $0x168] sm:$0xff]  ;;  %1376 = vmatpush.bf16.msrb.mxu3 %v2275_v35 }
  0x8b   : > { %440 = vst [vmem:[#allocation2 + $0x23] sm:$0xff] %v2648_v40  ;;  %v481_v27 = vld [vmem:[#allocation2 + $0x19] sm:$0xff] }
  0x8c   : > { %437 = vst [vmem:[#allocation2 + $0xb] sm:$0xff] %v2650_v41  ;;  %v800_v29 = vld [vmem:[#allocation2 + $0x1a] sm:$0xff] }
  0x8e   : > { %1377 = vmatpush.bf16.msrb.mxu3 %v2274_v43  ;;  %v1299_v43 = vld [vmem:[#allocation2 + $0x3d] sm:$0xff] }
  0x90   : > { %v407_v51 = vpop.permute.xlu0 %406  ;;  %v392_v52 = vpop.permute.xlu1 %391 }
  0x91   : > { %v2668_v55 = vmul.f32 %v407_v51, %v352_v46  ;;  %v2670_v56 = vmul.f32 %v392_v52, %v349_v48  ;;  %v932_v51 = vpack.c.bf16 %v2585_v61, %v2650_v41  ;;  %v2273_v52 = vld [vmem:[%s2881_s3 + $0x1d8] sm:$0xff]  ;;  %v2272_v61 = vld [vmem:[%s2881_s3 + $0x1d0] sm:$0xff] }
  0x92   : > { %v482_v60 = vld [vmem:[#allocation2 + $0x21] sm:$0xff]  ;;  %v483_v62 = vld [vmem:[#allocation2 + $0x29] sm:$0xff]  ;;  %1378 = vmatpush.bf16.msrb.mxu3 %v2273_v52 }
  0x93   : > { %445 = vst [vmem:[#allocation2 + $0x4b] sm:$0xff] %v2668_v55  ;;  %v479_v63 = vld [vmem:[#allocation2 + $0x9] sm:$0xff]  ;;  %v490_v0 = vpack.c.bf16 %v483_v62, %v482_v60  ;;  %v2680_v2 = vld [vmem:[#allocation2 + $0x12] sm:$0xff]  ;;  %v934_v23 = vpack.c.bf16 %v2670_v56, %v2622_v22  ;;  %v2270_v62 = vld [vmem:[%s2881_s3 + $0x1c0] sm:$0xff] }
  0x94   : > { %v798_v1 = vld [vmem:[#allocation2 + $0xa] sm:$0xff]  ;;  %442 = vst [vmem:[#allocation2 + $0x33] sm:$0xff] %v2670_v56  ;;  %v488_v3 = vpack.c.bf16 %v479_v63, %v478_v57  ;;  %v2709_v26 = vld [vmem:[#allocation2 + $0x22] sm:$0xff]  ;;  %v685_v41 = vpack.c.bf16 %v800_v29, %v2680_v2  ;;  %v2257_v57 = vld [vmem:[%s2881_s3 + $0x158] sm:$0xff] }
  0x95   : > { %v808_v4 = vpack.c.bf16 %v2680_v2, %v798_v1  ;;  %576 = vmatmul.bf16.vlgmr.msra.gmra.mxu1 %v490_v0  ;;  %v480_v25 = vld [vmem:[#allocation2 + $0x11] sm:$0xff]  ;;  %v809_v31 = vpack.c.bf16 %v2709_v26, %v800_v29  ;;  %v684_v38 = vpack.c.bf16 %v798_v1, %v674_v37  ;;  %v448_v45 = vld [vmem:[#allocation2 + $0x8] sm:$0xff]  ;;  %v2278_v22 = vld [vmem:[%s2881_s3 + $0x200] sm:$0xff] }
  0x96   : > { %566 = vmatmul.bf16.vlgmr.msra.gmra.mxu0 %v488_v3  ;;  %1126 = vmatpush.bf16.msra.mxu1 %v2261_v6  ;;  %v489_v30 = vpack.c.bf16 %v481_v27, %v480_v25  ;;  %v457_v48 = vpack.c.bf16 %v448_v45, %v2380_v10  ;;  %v802_v49 = vld [vmem:[#allocation2 + $0x2a] sm:$0xff]  ;;  %v2282_v10 = vld [vmem:[%s2881_s3 + $0x220] sm:$0xff]  ;;  %v450_v0 = vld [vmem:[#allocation2 + $0x18] sm:$0xff] }
  0x97   : > { %886 = vmatmul.bf16.vlgmr.msra.gmra.mxu3 %v808_v4  ;;  %1498 = vmatpush.bf16.msra.mxu0 %v2285_v7  ;;  %v449_v60 = vld [vmem:[#allocation2 + $0x10] sm:$0xff]  ;;  %v805_v2 = vld [vmem:[#allocation2 + $0x42] sm:$0xff]  ;;  %v933_v4 = vpack.c.bf16 %v2648_v40, %v2624_v24  ;;  %v686_v6 = vpack.c.bf16 %v802_v49, %v2709_v26 }
  0x98   : > { %v412_v8 = vpop.permute.xlu0 %411  ;;  %1379 = vmatpush.bf16.msrb.mxu3 %v2272_v61  ;;  %v458_v1 = vpack.c.bf16 %v450_v0, %v449_v60  ;;  %v2263_v7 = vld [vmem:[%s2881_s3 + $0x188] sm:$0xff]  ;;  %v2280_v24 = vld [vmem:[%s2881_s3 + $0x210] sm:$0xff]  ;;  %v1295_v25 = vld [vmem:[#allocation2 + $0x1d] sm:$0xff] }
  0x99   : > { %v2692_v9 = vmul.f32 %v412_v8, %v353_v5  ;;  %v2256_v5 = vld [vmem:[%s2881_s3 + $0x150] sm:$0xff]  ;;  %v2255_v40 = vld [vmem:[%s2881_s3 + $0x148] sm:$0xff]  ;;  %v451_v8 = vld [vmem:[#allocation2 + $0x20] sm:$0xff] }
  0x9a   : > { %v487_v12 = vld [vmem:[#allocation2 + $0x49] sm:$0xff]  ;;  %1127 = vmatpush.bf16.msra.mxu1 %v2260_v17  ;;  %v2262_v17 = vld [vmem:[%s2881_s3 + $0x180] sm:$0xff]  ;;  %v1294_v27 = vld [vmem:[#allocation2 + $0x15] sm:$0xff] }
  0x9b   : > { %446 = vst [vmem:[#allocation2 + $0x53] sm:$0xff] %v2692_v9  ;;  %v492_v14 = vpack.c.bf16 %v487_v12, %v486_v11  ;;  %v936_v15 = vpack.c.bf16 %v2692_v9, %v2668_v55  ;;  %v484_v20 = vld [vmem:[#allocation2 + $0x31] sm:$0xff]  ;;  %v485_v21 = vld [vmem:[#allocation2 + $0x39] sm:$0xff]  ;;  %1499 = vmatpush.bf16.msra.mxu0 %v2284_v33  ;;  %v452_v11 = vld [vmem:[#allocation2 + $0x28] sm:$0xff] }
  0x9c   : > { %v491_v28 = vpack.c.bf16 %v485_v21, %v484_v20  ;;  %v2736_v46 = vld [vmem:[#allocation2 + $0x32] sm:$0xff]  ;;  %1380 = vmatpush.bf16.msrb.mxu3 %v2271_v58  ;;  %v804_v63 = vld [vmem:[#allocation2 + $0x3a] sm:$0xff]  ;;  %v1296_v35 = vld [vmem:[#allocation2 + $0x25] sm:$0xff] }
  0x9d   : > { %586 = vmatmul.bf16.vlgmr.msra.gmra.mxu2 %v492_v14  ;;  %v810_v50 = vpack.c.bf16 %v2736_v46, %v802_v49  ;;  %v811_v3 = vpack.c.bf16 %v805_v2, %v804_v63  ;;  %v806_v14 = vld [vmem:[#allocation2 + $0x4a] sm:$0xff]  ;;  %v2254_v20 = vld [vmem:[%s2881_s3 + $0x140] sm:$0xff]  ;;  %v687_v21 = vpack.c.bf16 %v804_v63, %v2736_v46  ;;  %v1298_v47 = vld [vmem:[#allocation2 + $0x35] sm:$0xff] }
  0x9e   : > { %1250 = vmatpush.bf16.msra.mxu2 %v2269_v13  ;;  %1128 = vmatpush.bf16.msra.mxu1 %v2259_v36  ;;  %v459_v13 = vpack.c.bf16 %v452_v11, %v451_v8  ;;  %v453_v56 = vld [vmem:[#allocation2 + $0x30] sm:$0xff]  ;;  %v688_v29 = vpack.c.bf16 %v806_v14, %v805_v2  ;;  %v1171_v37 = vld [vmem:[#allocation2 + $0x1c] sm:$0xff]  ;;  %v1306_v45 = vpack.c.bf16 %v1299_v43, %v1298_v47  ;;  %v1172_v49 = vld [vmem:[#allocation2 + $0x24] sm:$0xff] }
  0x9f   : > { %1500 = vmatpush.bf16.msra.mxu0 %v2283_v42  ;;  %v1046_v34 = vld [vmem:[#allocation2 + $0xc] sm:$0xff]  ;;  %v1057_v52 = vpack.c.bf16 %v1172_v49, %v1171_v37  ;;  %v1303_v2 = vld [vmem:[#allocation2 + $0x5d] sm:$0xff] }
  0xa0   : > { %1381 = vmatpush.bf16.msrb.mxu3 %v2270_v62 }
  0xa2   : > { %1251 = vmatpush.bf16.msra.mxu2 %v2268_v18  ;;  %1129 = vmatpush.bf16.msra.mxu1 %v2258_v44  ;;  %v807_v12 = vld [vmem:[#allocation2 + $0x52] sm:$0xff]  ;;  %v2279_v18 = vld [vmem:[%s2881_s3 + $0x208] sm:$0xff] }
  0xa3   : > { %1501 = vmatpush.bf16.msra.mxu0 %v2282_v10  ;;  %v812_v16 = vpack.c.bf16 %v807_v12, %v806_v14  ;;  %v1418_v44 = vld [vmem:[#allocation2 + $0x16] sm:$0xff]  ;;  %v1301_v9 = vld [vmem:[#allocation2 + $0x4d] sm:$0xff]  ;;  %v1176_v14 = vld [vmem:[#allocation2 + $0x44] sm:$0xff] }
  0xa4   : > { %v1420_v10 = vld [vmem:[#allocation2 + $0x26] sm:$0xff]  ;;  %v1426_v43 = vld [vmem:[#allocation2 + $0x56] sm:$0xff] }
  0xa5   : > { %581 = vmatmul.bf16.gmra.mxu1 %v491_v28  ;;  %v1304_v28 = vpack.c.bf16 %v1295_v25, %v1294_v27  ;;  %v1177_v11 = vld [vmem:[#allocation2 + $0x4c] sm:$0xff] }
  0xa6   : > { %571 = vmatmul.bf16.gmra.mxu0 %v489_v30  ;;  %1252 = vmatpush.bf16.msra.mxu2 %v2267_v32  ;;  %v456_v30 = vld [vmem:[#allocation2 + $0x48] sm:$0xff]  ;;  %v455_v32 = vld [vmem:[#allocation2 + $0x40] sm:$0xff] }
  0xa7   : > { %891 = vmatmul.bf16.gmra.mxu3 %v809_v31  ;;  %1130 = vmatpush.bf16.msra.mxu1 %v2257_v57  ;;  %v1297_v31 = vld [vmem:[#allocation2 + $0x2d] sm:$0xff]  ;;  %v461_v33 = vpack.c.bf16 %v456_v30, %v455_v32  ;;  %v1179_v32 = vld [vmem:[#allocation2 + $0x5c] sm:$0xff] }
  0xa8   : > { %1502 = vmatpush.bf16.msra.mxu0 %v2281_v59  ;;  %v1305_v36 = vpack.c.bf16 %v1297_v31, %v1296_v35  ;;  %v1174_v57 = vld [vmem:[#allocation2 + $0x34] sm:$0xff]  ;;  %v1175_v59 = vld [vmem:[#allocation2 + $0x3c] sm:$0xff] }
  0xa9   : > { %v1182_v62 = vpack.c.bf16 %v1175_v59, %v1174_v57  ;;  %v1059_v25 = vpack.c.bf16 %v1176_v14, %v1175_v59  ;;  %v1178_v31 = vld [vmem:[#allocation2 + $0x54] sm:$0xff] }
  0xaa   : > { %1253 = vmatpush.bf16.msra.mxu2 %v2266_v39 }
  0xab   : > { %1131 = vmatpush.bf16.msra.mxu1 %v2256_v5 }
  0xac   : > { %1503 = vmatpush.bf16.msra.mxu0 %v2280_v24 }
  0xad   : > { %762 = vmatmul.bf16.vlgmr.msrb.gmra.mxu2 %v684_v38  ;;  %v1170_v38 = vld [vmem:[#allocation2 + $0x14] sm:$0xff] }
  0xae   : > { %1254 = vmatpush.bf16.msra.mxu2 %v2265_v54  ;;  %v1180_v39 = vpack.c.bf16 %v1171_v37, %v1170_v38  ;;  %v1056_v42 = vpack.c.bf16 %v1170_v38, %v1046_v34  ;;  %v1300_v54 = vld [vmem:[#allocation2 + $0x45] sm:$0xff] }
  0xaf   : > { %1132 = vmatpush.bf16.msra.mxu1 %v2255_v40  ;;  %v1307_v61 = vpack.c.bf16 %v1301_v9, %v1300_v54 }
  0xb0   : > { %1504 = vmatpush.bf16.msra.mxu0 %v2279_v18 }
  0xb2   : > { %1255 = vmatpush.bf16.msra.mxu2 %v2264_v19 }
  0xb3   : > { %1133 = vmatpush.bf16.msra.mxu1 %v2254_v20 }
  0xb4   : > { %1505 = vmatpush.bf16.msra.mxu0 %v2278_v22 }
  0xb5   : > { %648 = vmatmul.bf16.vlgmr.msrb.gmra.mxu1 %v457_v48  ;;  %v1173_v48 = vld [vmem:[#allocation2 + $0x2c] sm:$0xff] }
  0xb6   : > { %1010 = vmatmul.bf16.vlgmr.msrb.gmra.mxu0 %v932_v51  ;;  %1256 = vmatpush.bf16.msra.mxu2 %v2263_v7  ;;  %v1181_v55 = vpack.c.bf16 %v1173_v48, %v1172_v49  ;;  %v1423_v7 = vld [vmem:[#allocation2 + $0x3e] sm:$0xff] }
  0xb7   : > { %896 = vmatmul.bf16.gmra.mxu3 %v810_v50 }
  0xba   : > { %1257 = vmatpush.bf16.msra.mxu2 %v2262_v17  ;;  %v1183_v17 = vpack.c.bf16 %v1177_v11, %v1176_v14 }
  0xbd   : > { %767 = vmatmul.bf16.gmra.mxu2 %v685_v41 }
  0xc5   : > { %653 = vmatmul.bf16.gmra.mxu1 %v458_v1  ;;  %v1302_v1 = vld [vmem:[#allocation2 + $0x55] sm:$0xff] }
  0xc6   : > { %1015 = vmatmul.bf16.gmra.mxu0 %v933_v4  ;;  %v1308_v24 = vpack.c.bf16 %v1303_v2, %v1302_v1 }
  0xc7   : > { %901 = vmatmul.bf16.gmra.mxu3 %v811_v3  ;;  %v1422_v3 = vld [vmem:[#allocation2 + $0x36] sm:$0xff] }
  0xc8   : > { %v1430_v40 = vpack.c.bf16 %v1423_v7, %v1422_v3 }
  0xcd   : > { %772 = vmatmul.bf16.gmra.mxu2 %v686_v6  ;;  %v1058_v6 = vpack.c.bf16 %v1174_v57, %v1173_v48 }
  0xd5   : > { %658 = vmatmul.bf16.gmra.mxu1 %v459_v13 }
  0xd6   : > { %1020 = vmatmul.bf16.gmra.mxu0 %v934_v23  ;;  %v454_v23 = vld [vmem:[#allocation2 + $0x38] sm:$0xff] }
  0xd7   : > { %906 = vmatmul.bf16.gmra.mxu3 %v812_v16  ;;  %v460_v26 = vpack.c.bf16 %v454_v23, %v453_v56 }
  0xdd   : > { %777 = vmatmul.bf16.gmra.mxu2 %v687_v21  ;;  %v1425_v21 = vld [vmem:[#allocation2 + $0x4e] sm:$0xff] }
  0xe5   : > { %663 = vmatmul.bf16.gmra.mxu1 %v460_v26  ;;  %v1424_v26 = vld [vmem:[#allocation2 + $0x46] sm:$0xff] }
  0xe6   : > { %1025 = vmatmul.bf16.gmra.mxu0 %v935_v53  ;;  %v1419_v53 = vld [vmem:[#allocation2 + $0x1e] sm:$0xff]  ;;  %v1431_v27 = vpack.c.bf16 %v1425_v21, %v1424_v26 }
  0xe7   : > { %1382 = vmatmul.bf16.vlgmr.msrb.gmra.mxu3 %v1304_v28  ;;  %v1428_v46 = vpack.c.bf16 %v1419_v53, %v1418_v44  ;;  %v1427_v44 = vld [vmem:[#allocation2 + $0x5e] sm:$0xff] }
  0xe8   : > { %v1432_v9 = vpack.c.bf16 %v1427_v44, %v1426_v43 }
  0xed   : > { %782 = vmatmul.bf16.gmra.mxu2 %v688_v29 }
  0xf5   : > { %668 = vmatmul.bf16.gmra.mxu1 %v461_v33 }
  0xf6   : > { %1030 = vmatmul.bf16.gmra.mxu0 %v936_v15  ;;  %v1421_v15 = vld [vmem:[#allocation2 + $0x2e] sm:$0xff] }
  0xf7   : > { %1387 = vmatmul.bf16.gmra.mxu3 %v1305_v36  ;;  %v1429_v41 = vpack.c.bf16 %v1421_v15, %v1420_v10 }
  0xfd   : > { %1258 = vmatmul.bf16.vlgmr.msra.gmra.mxu2 %v1180_v39  ;;  %v1184_v39 = vpack.c.bf16 %v1179_v32, %v1178_v31 }
 0x105   : > { %1134 = vmatmul.bf16.vlgmr.msra.gmra.mxu1 %v1056_v42 }
 0x106   : > { %1506 = vmatmul.bf16.vlgmr.msra.gmra.mxu0 %v1428_v46 }
 0x107   : > { %1392 = vmatmul.bf16.gmra.mxu3 %v1306_v45 }
 0x10d   : > { %1263 = vmatmul.bf16.gmra.mxu2 %v1181_v55  ;;  %v1060_v55 = vpack.c.bf16 %v1178_v31, %v1177_v11 }
 0x112   : > { %v2807_v50 = vpop.f32.mrf.mxu1 }
 0x113   : > { %v567_v51 = vpop.f32.mrf.mxu0 }
 0x115   : > { %1139 = vmatmul.bf16.gmra.mxu1 %v1057_v52 }
 0x116   : > { %1511 = vmatmul.bf16.gmra.mxu0 %v1429_v41 }
 0x117   : > { %1397 = vmatmul.bf16.gmra.mxu3 %v1307_v61 }
 0x11a   : > { %v887_v58 = vpop.f32.mrf.mxu3  ;;  %v2809_v19 = vpop.f32.mrf.mxu1 }
 0x11b   : > { %v569_v60 = vpop.f32.mrf.mxu0 }
 0x11d   : > { %1268 = vmatmul.bf16.gmra.mxu2 %v1182_v62 }
 0x120   : > { %v2811_v63 = vpop.f32.mrf.mxu2 }
 0x122   : > { %v889_v0 = vpop.f32.mrf.mxu3  ;;  %v2813_v4 = vpop.f32.mrf.mxu1 }
 0x123   : > { %v572_v5 = vpop.f32.mrf.mxu0 }
 0x125   : > { %1144 = vmatmul.bf16.gmra.mxu1 %v1058_v6 }
 0x126   : > { %1516 = vmatmul.bf16.gmra.mxu0 %v1430_v40 }
 0x127   : > { %1402 = vmatmul.bf16.gmra.mxu3 %v1308_v24 }
 0x128   : > { %v2815_v8 = vpop.f32.mrf.mxu2 }
 0x12a   : > { %v892_v12 = vpop.f32.mrf.mxu3  ;;  %v2817_v13 = vpop.f32.mrf.mxu1 }
 0x12b   : > { %v574_v16 = vpop.f32.mrf.mxu0 }
 0x12d   : > { %1273 = vmatmul.bf16.gmra.mxu2 %v1183_v17 }
 0x130   : > { %v763_v18 = vpop.f32.mrf.mxu2 }
 0x132   : > { %v894_v20 = vpop.f32.mrf.mxu3  ;;  %v649_v22 = vpop.f32.mrf.mxu1 }
 0x133   : > { %v650_v56 = vadd.f32 %v649_v22, %v567_v51  ;;  %v1011_v23 = vpop.f32.mrf.mxu0 }
 0x135   : > { %v788_v28 = vadd.f32 %v763_v18, %v650_v56  ;;  %1149 = vmatmul.bf16.gmra.mxu1 %v1059_v25 }
 0x136   : > { %1521 = vmatmul.bf16.gmra.mxu0 %v1431_v27 }
 0x137   : > { %v912_v29 = vadd.f32 %v887_v58, %v788_v28 }
 0x138   : > { %v765_v30 = vpop.f32.mrf.mxu2 }
 0x139   : > { %v2819_v33 = vadd.f32 %v1011_v23, %v912_v29 }
 0x13a   : > { %v897_v35 = vpop.f32.mrf.mxu3  ;;  %v651_v36 = vpop.f32.mrf.mxu1 }
 0x13b   : > { %v652_v37 = vadd.f32 %v651_v36, %v569_v60  ;;  %v1013_v38 = vpop.f32.mrf.mxu0 }
 0x13d   : > { %v789_v34 = vadd.f32 %v765_v30, %v652_v37  ;;  %1278 = vmatmul.bf16.gmra.mxu2 %v1184_v39 }
 0x13f   : > { %v913_v47 = vadd.f32 %v889_v0, %v789_v34 }
 0x140   : > { %v768_v53 = vpop.f32.mrf.mxu2 }
 0x141   : > { %v2821_v42 = vadd.f32 %v1013_v38, %v913_v47 }
 0x142   : > { %v899_v45 = vpop.f32.mrf.mxu3  ;;  %v654_v46 = vpop.f32.mrf.mxu1 }
 0x143   : > { %v655_v48 = vadd.f32 %v654_v46, %v572_v5  ;;  %v1016_v49 = vpop.f32.mrf.mxu0 }
 0x145   : > { %v790_v15 = vadd.f32 %v768_v53, %v655_v48  ;;  %1154 = vmatmul.bf16.gmra.mxu1 %v1060_v55 }
 0x146   : > { %1526 = vmatmul.bf16.gmra.mxu0 %v1432_v9 }
 0x147   : > { %v914_v51 = vadd.f32 %v892_v12, %v790_v15 }
 0x148   : > { %v770_v52 = vpop.f32.mrf.mxu2 }
 0x149   : > { %v2823_v54 = vadd.f32 %v1016_v49, %v914_v51 }
 0x14a   : > { %v656_v10 = vpop.f32.mrf.mxu1  ;;  %v902_v57 = vpop.f32.mrf.mxu3 }
 0x14b   : > { %v657_v61 = vadd.f32 %v656_v10, %v574_v16  ;;  %v1018_v41 = vpop.f32.mrf.mxu0 }
 0x14d   : > { %v791_v58 = vadd.f32 %v770_v52, %v657_v61 }
 0x14f   : > { %v915_v59 = vadd.f32 %v894_v20, %v791_v58 }
 0x150   : > { %v773_v60 = vpop.f32.mrf.mxu2 }
 0x151   : > { %v2825_v62 = vadd.f32 %v1018_v41, %v915_v59  ;;  %v1555_v59 = vpop.permute.xlu1 %1554 }
 0x152   : > { %v659_v0 = vpop.f32.mrf.mxu1  ;;  %v904_v5 = vpop.f32.mrf.mxu3 }
 0x153   : > { %v660_v1 = vadd.f32 %v659_v0, %v2807_v50  ;;  %v1021_v2 = vpop.f32.mrf.mxu0 }
 0x155   : > { %v792_v3 = vadd.f32 %v773_v60, %v660_v1 }
 0x157   : > { %v916_v6 = vadd.f32 %v897_v35, %v792_v3  ;;  %v1560_v3 = vpop.permute.xlu2 %1559 }
 0x158   : > { %v775_v7 = vpop.f32.mrf.mxu2 }
 0x159   : > { %v2828_v24 = vadd.f32 %v1021_v2, %v916_v6 }
 0x15a   : > { %v661_v40 = vpop.f32.mrf.mxu1  ;;  %v907_v17 = vpop.f32.mrf.mxu3 }
 0x15b   : > { %v662_v11 = vadd.f32 %v661_v40, %v2809_v19  ;;  %v1023_v12 = vpop.f32.mrf.mxu0 }
 0x15d   : > { %v793_v14 = vadd.f32 %v775_v7, %v662_v11 }
 0x15f   : > { %v917_v16 = vadd.f32 %v899_v45, %v793_v14 }
 0x160   : > { %v778_v18 = vpop.f32.mrf.mxu2 }
 0x161   : > { %v2831_v20 = vadd.f32 %v1023_v12, %v917_v16 }
 0x162   : > { %v664_v21 = vpop.f32.mrf.mxu1  ;;  %v909_v27 = vpop.f32.mrf.mxu3 }
 0x163   : > { %v665_v50 = vadd.f32 %v664_v21, %v2813_v4  ;;  %v1026_v22 = vpop.f32.mrf.mxu0 }
 0x165   : > { %v794_v56 = vadd.f32 %v778_v18, %v665_v50 }
 0x167   : > { %v918_v23 = vadd.f32 %v902_v57, %v794_v56 }
 0x168   : > { %v780_v25 = vpop.f32.mrf.mxu2 }
 0x169   : > { %v2834_v26 = vadd.f32 %v1026_v22, %v918_v23 }
 0x16a   : > { %v666_v28 = vpop.f32.mrf.mxu1  ;;  %v1383_v38 = vpop.f32.mrf.mxu3 }
 0x16b   : > { %v667_v19 = vadd.f32 %v666_v28, %v2817_v13  ;;  %v1028_v29 = vpop.f32.mrf.mxu0 }
 0x16d   : > { %v795_v30 = vadd.f32 %v780_v25, %v667_v19  ;;  %v1565_v25 = vpop.permute.xlu0 %1564 }
 0x16f   : > { %v919_v31 = vadd.f32 %v904_v5, %v795_v30 }
 0x170   : > { %v783_v32 = vpop.f32.mrf.mxu2 }
 0x171   : > { %v2837_v35 = vadd.f32 %v1028_v29, %v919_v31 }
 0x172   : > { %v669_v36 = vpop.f32.mrf.mxu1  ;;  %v1385_v46 = vpop.f32.mrf.mxu3 }
 0x173   : > { %v670_v37 = vadd.f32 %v669_v36, %v2811_v63  ;;  %v1031_v4 = vpop.f32.mrf.mxu0 }
 0x175   : > { %v796_v39 = vadd.f32 %v783_v32, %v670_v37 }
 0x177   : > { %v920_v34 = vadd.f32 %v907_v17, %v796_v39 }
 0x178   : > { %v785_v47 = vpop.f32.mrf.mxu2 }
 0x179   : > { %v2840_v53 = vadd.f32 %v1031_v4, %v920_v34 }
 0x17a   : > { %v671_v43 = vpop.f32.mrf.mxu1  ;;  %v1388_v10 = vpop.f32.mrf.mxu3 }
 0x17b   : > { %v672_v44 = vadd.f32 %v671_v43, %v2815_v8  ;;  %v1033_v13 = vpop.f32.mrf.mxu0  ;;  %v1570_v43 = vpop.permute.xlu1 %1569 }
 0x17d   : > { %v797_v45 = vadd.f32 %v785_v47, %v672_v44 }
 0x17f   : > { %v921_v48 = vadd.f32 %v909_v27, %v797_v45 }
 0x180   : > { %v1259_v49 = vpop.f32.mrf.mxu2 }
 0x181   : > { %v2843_v55 = vadd.f32 %v1033_v13, %v921_v48 }
 0x182   : > { %v1135_v9 = vpop.f32.mrf.mxu1 }
 0x183   : > { %v1160_v63 = vadd.f32 %v1135_v9, %v2819_v33  ;;  %v1507_v15 = vpop.f32.mrf.mxu0  ;;  %v1390_v33 = vpop.f32.mrf.mxu3 }
 0x185   : > { %v1284_v51 = vadd.f32 %v1259_v49, %v1160_v63 }
 0x187   : > { %v1408_v52 = vadd.f32 %v1383_v38, %v1284_v51 }
 0x188   : > { %v1261_v61 = vpop.f32.mrf.mxu2 }
 0x189   : > { %v1532_v41 = vadd.f32 %v1507_v15, %v1408_v52 }
 0x18a   : > { %v1137_v57 = vpop.f32.mrf.mxu1 }
 0x18b   : > { %v1161_v8 = vadd.f32 %v1137_v57, %v2821_v42  ;;  %v1509_v58 = vpop.f32.mrf.mxu0  ;;  %v1602_v60 = vmul.f32 %v1555_v59, %v1532_v41  ;;  %v1393_v31 = vpop.f32.mrf.mxu3 }
 0x18c   : > { %v1575_v57 = vpop.permute.xlu2 %1574 }
 0x18d   : > { %v1285_v0 = vadd.f32 %v1261_v61, %v1161_v8  ;;  %v1612_v5 = vpack.c.bf16 %v1602_v60, %v1602_v60 }
 0x18f   : > { %v1409_v1 = vadd.f32 %v1385_v46, %v1285_v0  ;;  %v1632_v42 = vunpack.c.l.bf16 %v1612_v5 }
 0x190   : > { %v1264_v2 = vpop.f32.mrf.mxu2 }
 0x191   : > { %v1533_v6 = vadd.f32 %v1509_v58, %v1409_v1  ;;  %v1658_v22 = vmul.f32 %v1632_v42, %v1632_v42 }
 0x192   : > { %v1140_v7 = vpop.f32.mrf.mxu1 }
 0x193   : > { %v1603_v40 = vmul.f32 %v1560_v3, %v1533_v6  ;;  %v1162_v11 = vadd.f32 %v1140_v7, %v2823_v54  ;;  %v1512_v12 = vpop.f32.mrf.mxu0  ;;  %v1395_v63 = vpop.f32.mrf.mxu3 }
 0x195   : > { %v1613_v14 = vpack.c.bf16 %v1603_v40, %v1603_v40  ;;  %v2309_v16 = vpack.c.bf16 %v1603_v40, %v1602_v60  ;;  %v1286_v17 = vadd.f32 %v1264_v2, %v1162_v11  ;;  %v1580_v11 = vpop.permute.xlu0 %1579 }
 0x197   : > { %2310 = vst [vmem:[%s2853_s18] sm:$0xff] %v2309_v16   ;;  %v1633_v18 = vunpack.c.l.bf16 %v1613_v14  ;;  %v1410_v21 = vadd.f32 %v1388_v10, %v1286_v17 }
 0x198   : > { %v1266_v50 = vpop.f32.mrf.mxu2 }
 0x199   : > { %v1642_v56 = vadd.f32 %v1633_v18, %v1632_v42  ;;  %v1659_v23 = vmul.f32 %v1633_v18, %v1633_v18  ;;  %v1534_v54 = vadd.f32 %v1512_v12, %v1410_v21 }
 0x19a   : > { %v1142_v27 = vpop.f32.mrf.mxu1 }
 0x19b   : > { %v1668_v28 = vadd.f32 %v1659_v23, %v1658_v22  ;;  %v1604_v19 = vmul.f32 %v1565_v25, %v1534_v54  ;;  %v1163_v29 = vadd.f32 %v1142_v27, %v2825_v62  ;;  %v1514_v30 = vpop.f32.mrf.mxu0  ;;  %v1398_v5 = vpop.f32.mrf.mxu3 }
 0x19c   : > { %v1585_v23 = vpop.permute.xlu1 %1584 }
 0x19d   : > { %v1614_v32 = vpack.c.bf16 %v1604_v19, %v1604_v19  ;;  %v1287_v36 = vadd.f32 %v1266_v50, %v1163_v29 }
 0x19f   : > { %v1634_v37 = vunpack.c.l.bf16 %v1614_v32  ;;  %v1411_v4 = vadd.f32 %v1390_v33, %v1287_v36 }
 0x1a0   : > { %v1269_v38 = vpop.f32.mrf.mxu2 }
 0x1a1   : > { %v1643_v39 = vadd.f32 %v1642_v56, %v1634_v37  ;;  %v1660_v34 = vmul.f32 %v1634_v37, %v1634_v37  ;;  %v1535_v47 = vadd.f32 %v1514_v30, %v1411_v4 }
 0x1a2   : > { %v1145_v44 = vpop.f32.mrf.mxu1 }
 0x1a3   : > { %v1669_v13 = vadd.f32 %v1668_v28, %v1660_v34  ;;  %v1605_v45 = vmul.f32 %v1570_v43, %v1535_v47  ;;  %v1164_v46 = vadd.f32 %v1145_v44, %v2828_v24  ;;  %v1517_v48 = vpop.f32.mrf.mxu0  ;;  %v1400_v28 = vpop.f32.mrf.mxu3 }
 0x1a5   : > { %v1615_v49 = vpack.c.bf16 %v1605_v45, %v1605_v45  ;;  %v2314_v62 = vpack.c.bf16 %v1605_v45, %v1604_v19  ;;  %v1288_v9 = vadd.f32 %v1269_v38, %v1164_v46  ;;  %v1590_v38 = vpop.permute.xlu2 %1589 }
 0x1a7   : > { %2335 = vst [vmem:[%s2853_s18 + $0x8] sm:$0xff] %v2314_v62   ;;  %v1635_v15 = vunpack.c.l.bf16 %v1615_v49  ;;  %v1412_v51 = vadd.f32 %v1393_v31, %v1288_v9 }
 0x1a8   : > { %v1271_v52 = vpop.f32.mrf.mxu2 }
 0x1a9   : > { %v1644_v10 = vadd.f32 %v1643_v39, %v1635_v15  ;;  %v1661_v61 = vmul.f32 %v1635_v15, %v1635_v15  ;;  %v1536_v41 = vadd.f32 %v1517_v48, %v1412_v51 }
 0x1aa   : > { %v1147_v8 = vpop.f32.mrf.mxu1 }
 0x1ab   : > { %v1670_v58 = vadd.f32 %v1669_v13, %v1661_v61  ;;  %v1606_v59 = vmul.f32 %v1575_v57, %v1536_v41  ;;  %v1165_v60 = vadd.f32 %v1147_v8, %v2831_v20  ;;  %v1519_v0 = vpop.f32.mrf.mxu0  ;;  %v1403_v48 = vpop.f32.mrf.mxu3 }
 0x1ac   : > { %v1595_v61 = vpop.permute.xlu0 %1594 }
 0x1ad   : > { %v1616_v24 = vpack.c.bf16 %v1606_v59, %v1606_v59  ;;  %v1289_v1 = vadd.f32 %v1271_v52, %v1165_v60 }
 0x1af   : > { %v1636_v2 = vunpack.c.l.bf16 %v1616_v24  ;;  %v1413_v3 = vadd.f32 %v1395_v63, %v1289_v1 }
 0x1b0   : > { %v1274_v6 = vpop.f32.mrf.mxu2 }
 0x1b1   : > { %v1645_v33 = vadd.f32 %v1644_v10, %v1636_v2  ;;  %v1662_v7 = vmul.f32 %v1636_v2, %v1636_v2  ;;  %v1537_v40 = vadd.f32 %v1519_v0, %v1413_v3 }
 0x1b2   : > { %v1150_v12 = vpop.f32.mrf.mxu1 }
 0x1b3   : > { %v1671_v42 = vadd.f32 %v1670_v58, %v1662_v7  ;;  %v1607_v14 = vmul.f32 %v1580_v11, %v1537_v40  ;;  %v1166_v16 = vadd.f32 %v1150_v12, %v2834_v26  ;;  %v1522_v17 = vpop.f32.mrf.mxu0  ;;  %v1405_v0 = vpop.f32.mrf.mxu3 }
 0x1b5   : > { %v1617_v18 = vpack.c.bf16 %v1607_v14, %v1607_v14  ;;  %v2319_v20 = vpack.c.bf16 %v1607_v14, %v1606_v59  ;;  %v1290_v21 = vadd.f32 %v1274_v6, %v1166_v16 }
 0x1b7   : > { %2336 = vst [vmem:[%s2853_s18 + $0x10] sm:$0xff] %v2319_v20   ;;  %v1637_v50 = vunpack.c.l.bf16 %v1617_v18  ;;  %v1414_v22 = vadd.f32 %v1398_v5, %v1290_v21 }
 0x1b8   : > { %v1276_v56 = vpop.f32.mrf.mxu2 }
 0x1b9   : > { %v1646_v54 = vadd.f32 %v1645_v33, %v1637_v50  ;;  %v1663_v25 = vmul.f32 %v1637_v50, %v1637_v50  ;;  %v1538_v27 = vadd.f32 %v1522_v17, %v1414_v22  ;;  %v1600_v33 = vpop.permute.xlu1 %1599 }
 0x1ba   : > { %v1152_v19 = vpop.f32.mrf.mxu1 }
 0x1bb   : > { %v1672_v29 = vadd.f32 %v1671_v42, %v1663_v25  ;;  %v1608_v30 = vmul.f32 %v1585_v23, %v1538_v27  ;;  %v1167_v31 = vadd.f32 %v1152_v19, %v2837_v35  ;;  %v1524_v32 = vpop.f32.mrf.mxu0 }
 0x1bd   : > { %v1618_v26 = vpack.c.bf16 %v1608_v30, %v1608_v30  ;;  %v1291_v36 = vadd.f32 %v1276_v56, %v1167_v31 }
 0x1bf   : > { %v1638_v37 = vunpack.c.l.bf16 %v1618_v26  ;;  %v1415_v4 = vadd.f32 %v1400_v28, %v1291_v36 }
 0x1c0   : > { %v1279_v43 = vpop.f32.mrf.mxu2 }
 0x1c1   : > { %v1647_v39 = vadd.f32 %v1646_v54, %v1638_v37  ;;  %v1664_v34 = vmul.f32 %v1638_v37, %v1638_v37  ;;  %v1539_v47 = vadd.f32 %v1524_v32, %v1415_v4 }
 0x1c2   : > { %v1155_v44 = vpop.f32.mrf.mxu1 }
 0x1c3   : > { %v1673_v13 = vadd.f32 %v1672_v29, %v1664_v34  ;;  %v1609_v45 = vmul.f32 %v1590_v38, %v1539_v47  ;;  %v1168_v46 = vadd.f32 %v1155_v44, %v2840_v53  ;;  %v1527_v9 = vpop.f32.mrf.mxu0 }
 0x1c5   : > { %v1619_v49 = vpack.c.bf16 %v1609_v45, %v1609_v45  ;;  %v2324_v62 = vpack.c.bf16 %v1609_v45, %v1608_v30  ;;  %v1292_v35 = vadd.f32 %v1279_v43, %v1168_v46 }
 0x1c7   : > { %2337 = vst [vmem:[%s2853_s18 + $0x18] sm:$0xff] %v2324_v62   ;;  %v1639_v63 = vunpack.c.l.bf16 %v1619_v49  ;;  %v1416_v15 = vadd.f32 %v1403_v48, %v1292_v35 }
 0x1c8   : > { %v1281_v59 = vpop.f32.mrf.mxu2 }
 0x1c9   : > { %v1648_v51 = vadd.f32 %v1647_v39, %v1639_v63  ;;  %v1665_v52 = vmul.f32 %v1639_v63, %v1639_v63  ;;  %v1540_v10 = vadd.f32 %v1527_v9, %v1416_v15 }
 0x1ca   : > { %v1157_v41 = vpop.f32.mrf.mxu1 }
 0x1cb   : > { %v1674_v57 = vadd.f32 %v1673_v13, %v1665_v52  ;;  %v1610_v8 = vmul.f32 %v1595_v61, %v1540_v10  ;;  %v1169_v58 = vadd.f32 %v1157_v41, %v2843_v55  ;;  %v1529_v2 = vpop.f32.mrf.mxu0 }
 0x1cd   : > { %v1620_v53 = vpack.c.bf16 %v1610_v8, %v1610_v8  ;;  %v1293_v60 = vadd.f32 %v1281_v59, %v1169_v58 }
 0x1cf   : > { %v1640_v24 = vunpack.c.l.bf16 %v1620_v53  ;;  %v1417_v1 = vadd.f32 %v1405_v0, %v1293_v60 }
 0x1d1   : > { %v1649_v3 = vadd.f32 %v1648_v51, %v1640_v24  ;;  %v1666_v5 = vmul.f32 %v1640_v24, %v1640_v24  ;;  %v1541_v6 = vadd.f32 %v1529_v2, %v1417_v1 }
 0x1d3   : > { %v1675_v7 = vadd.f32 %v1674_v57, %v1666_v5  ;;  %v1611_v40 = vmul.f32 %v1600_v33, %v1541_v6 }
 0x1d5   : > { %v1621_v11 = vpack.c.bf16 %v1611_v40, %v1611_v40  ;;  %v2329_v12 = vpack.c.bf16 %v1611_v40, %v1610_v8 }
 0x1d7   : > { %2338 = vst [vmem:[%s2853_s18 + $0x20] sm:$0xff] %v2329_v12   ;;  %v1641_v42 = vunpack.c.l.bf16 %v1621_v11 }
 0x1d9   : > { %v1650_v55 = vadd.f32 %v1649_v3, %v1641_v42  ;;  %v1667_v14 = vmul.f32 %v1641_v42, %v1641_v42 }
 0x1db   : > { %v1651_v16 = vrot.slane %v1650_v55, 4  ;;  %v1676_v17 = vadd.f32 %v1675_v7, %v1667_v14 }
 0x1dd   : > { %v1652_v18 = vadd.f32 %v1651_v16, %v1650_v55  ;;  %v1677_v20 = vrot.slane %v1676_v17, 4 }
 0x1df   : > { %v1653_v21 = vrot.slane %v1652_v18, 2  ;;  %v1678_v50 = vadd.f32 %v1677_v20, %v1676_v17 }
 0x1e1   : > { %v1654_v22 = vadd.f32 %v1653_v21, %v1652_v18  ;;  %v1679_v56 = vrot.slane %v1678_v50, 2 }
 0x1e3   : > { %v1655_v23 = vrot.slane %v1654_v22, 1  ;;  %v1680_v54 = vadd.f32 %v1679_v56, %v1678_v50 }
 0x1e5   : > { %v1656_v25 = vadd.f32 %v1655_v23, %v1654_v22  ;;  %v1681_v27 = vrot.slane %v1680_v54, 1 }
 0x1e7   : > { %1657 = vst [vmem:[%s292_s20] sm:$0x1] %v1656_v25  ;;  %v1682_v28 = vadd.f32 %v1681_v27, %v1680_v54 }
 0x1e9   : > { %1683 = vst [vmem:[%s295_s23] sm:$0x1] %v1682_v28 }
 0x1ea PF: > { %s18_s24 = sadd.s32 1, %s2377_s24  }
 0x1eb   : > { %p15_p4 = scmp.ge.s32.totalorder %s18_s24, 4  }
 0x1ed   :  { %17 = sbr.rel (!%p15_p4) target bundleno = 1 (0x1), region = 102 }

</bundles_post_ra>
